<compile_context>
chip_gen: v7x
topology: tpu7x:2x2x1
jax: 0.10.0
libtpu: 0.0.40
codegen_flags: <defaults>
</compile_context>

<pallas_src>
import functools
import numpy as np
import jax
import jax.numpy as jnp
from jax.experimental import pallas as pl
from jax.experimental.pallas import tpu as pltpu


def _cp(dims):
    return pltpu.CompilerParams(
        dimension_semantics=dims,
        vmem_limit_bytes=48 * 1024 * 1024,
    )


def _pick_tile(dim, candidates):
    for t in candidates:
        if dim % t == 0:
            return t
    return dim


# ---------------------------------------------------------------------------
# Gridded matmul with fused epilogue:  out = epi((X @ W) * s + b)
#   epi = [ReLU] -> [+ residual] -> [ReLU(post_s * . + post_b)]
# ---------------------------------------------------------------------------

def _matmul_kernel(*refs, relu, has_res, has_post):
    x_ref, w_ref, s_ref, b_ref = refs[:4]
    idx = 4
    if has_res:
        res_ref = refs[idx]
        idx += 1
    if has_post:
        ps_ref = refs[idx]
        pb_ref = refs[idx + 1]
        idx += 2
    o_ref = refs[idx]
    acc_ref = refs[idx + 1]

    @pl.when(pl.program_id(2) == 0)
    def _init():
        acc_ref[...] = jnp.zeros_like(acc_ref)

    acc_ref[...] += jnp.dot(x_ref[...], w_ref[...],
                            preferred_element_type=jnp.float32)

    @pl.when(pl.program_id(2) == pl.num_programs(2) - 1)
    def _epilogue():
        y = acc_ref[...] * s_ref[...] + b_ref[...]
        if relu:
            y = jnp.maximum(y, 0.0)
        if has_res:
            y = y + res_ref[...]
        if has_post:
            y = jnp.maximum(y * ps_ref[...] + pb_ref[...], 0.0)
        o_ref[...] = y


def matmul_fused(x, w, scale, shift, *, relu=False, residual=None, post=None):
    """(M,K)@(K,N) with fused BN scale/shift, optional ReLU / residual add /
    post BN+ReLU.  Operands in bf16, accumulation in f32."""
    M, K = x.shape
    N = w.shape[1]
    tm = _pick_tile(M, (256, 128, 64, 32, 16, 8))
    tk = _pick_tile(K, (512, 256, 128))
    tn = _pick_tile(N, (512, 256, 128))
    has_res = residual is not None
    has_post = post is not None

    inputs = [x.astype(jnp.bfloat16), w.astype(jnp.bfloat16),
              scale.reshape(1, N).astype(jnp.float32),
              shift.reshape(1, N).astype(jnp.float32)]
    in_specs = [
        pl.BlockSpec((tm, tk), lambda i, j, k: (i, k)),
        pl.BlockSpec((tk, tn), lambda i, j, k: (k, j)),
        pl.BlockSpec((1, tn), lambda i, j, k: (0, j)),
        pl.BlockSpec((1, tn), lambda i, j, k: (0, j)),
    ]
    if has_res:
        inputs.append(residual.astype(jnp.float32))
        in_specs.append(pl.BlockSpec((tm, tn), lambda i, j, k: (i, j)))
    if has_post:
        ps, pb = post
        inputs += [ps.reshape(1, N).astype(jnp.float32),
                   pb.reshape(1, N).astype(jnp.float32)]
        in_specs += [pl.BlockSpec((1, tn), lambda i, j, k: (0, j)),
                     pl.BlockSpec((1, tn), lambda i, j, k: (0, j))]

    return pl.pallas_call(
        functools.partial(_matmul_kernel, relu=relu,
                          has_res=has_res, has_post=has_post),
        out_shape=jax.ShapeDtypeStruct((M, N), jnp.float32),
        grid=(M // tm, N // tn, K // tk),
        in_specs=in_specs,
        out_specs=pl.BlockSpec((tm, tn), lambda i, j, k: (i, j)),
        scratch_shapes=[pltpu.VMEM((tm, tn), jnp.float32)],
        compiler_params=_cp(("parallel", "parallel", "arbitrary")),
    )(*inputs)


# ---------------------------------------------------------------------------
# Row-flattened 3x3 conv (stride 1) and fused SeparableConv unit
# ---------------------------------------------------------------------------

def _flat_pad(x, dtype):
    """Zero-pad (top 1, bottom 2, left 1, right 1) and row-flatten:
    (N,H,W,C) -> (N, (H+3)*(W+2), C).  The reshape is free (contiguous)."""
    xp = jnp.pad(x.astype(dtype), ((0, 0), (1, 2), (1, 1), (0, 0)))
    N, Hp, Wp, C = xp.shape
    return xp.reshape(N, Hp * Wp, C)


def _conv3x3_flat_kernel(x_ref, w_ref, s_ref, b_ref, o_ref, *, H, Wp, relu):
    # x_ref: (1,(H+3)*Wp,Cin) f32 | w_ref: (9,Cin,Cout) bf16 | o_ref: (1,H*Wp,Cout)
    M = H * Wp
    Cout = o_ref.shape[-1]
    x = x_ref[0]
    acc = jnp.zeros((M, Cout), jnp.float32)
    for dy in range(3):
        for dx in range(3):
            off = dy * Wp + dx
            slab = x[off:off + M, :].astype(jnp.bfloat16)
            acc = acc + jnp.dot(slab, w_ref[dy * 3 + dx],
                                preferred_element_type=jnp.float32)
    y = acc * s_ref[...] + b_ref[...]
    if relu:
        y = jnp.maximum(y, 0.0)
    o_ref[0] = y


def conv3x3_bn_wide(x, w, scale, shift, relu):
    """3x3 conv (stride 1, pad 1) + BN scale/shift (+ReLU).  Returns a 'wide'
    (N, H, W+2, Cout) tensor; the last two columns are junk and are sliced off
    by the caller (XLA fuses the slice into the consumer)."""
    N, H, W, Cin = x.shape
    Cout = w.shape[-1]
    Wp = W + 2
    xf = _flat_pad(x, jnp.float32)
    wf = w.reshape(9, Cin, Cout).astype(jnp.bfloat16)
    y = pl.pallas_call(
        functools.partial(_conv3x3_flat_kernel, H=H, Wp=Wp, relu=relu),
        out_shape=jax.ShapeDtypeStruct((N, H * Wp, Cout), jnp.float32),
        grid=(N,),
        in_specs=[
            pl.BlockSpec((1, (H + 3) * Wp, Cin), lambda n: (n, 0, 0)),
            pl.BlockSpec((9, Cin, Cout), lambda n: (0, 0, 0)),
            pl.BlockSpec((1, Cout), lambda n: (0, 0)),
            pl.BlockSpec((1, Cout), lambda n: (0, 0)),
        ],
        out_specs=pl.BlockSpec((1, H * Wp, Cout), lambda n: (n, 0, 0)),
        compiler_params=_cp(("parallel",)),
    )(xf, wf, scale.reshape(1, Cout), shift.reshape(1, Cout))
    return y.reshape(N, H, Wp, Cout)


def _sepconv_flat_kernel(x_ref, dw_ref, pw_ref, s_ref, b_ref, o_ref,
                         *, H, Wp, relu_in):
    # Fused [ReLU] -> depthwise3x3 -> pointwise1x1 -> BN for one image.
    # x_ref: (1,(H+3)*Wp,Cin) bf16 | dw_ref: (9,1,Cin) f32 | pw_ref: (Cin,Cout) bf16
    Cin = x_ref.shape[-1]
    M = H * Wp
    x = x_ref[0].astype(jnp.float32)
    if relu_in:
        x = jnp.maximum(x, 0.0)      # relu(0)=0, so pad-then-relu == relu-then-pad
    acc = jnp.zeros((M, Cin), jnp.float32)
    for dy in range(3):
        for dx in range(3):
            off = dy * Wp + dx
            acc = acc + x[off:off + M, :] * dw_ref[dy * 3 + dx]
    y = jnp.dot(acc.astype(jnp.bfloat16), pw_ref[...],
                preferred_element_type=jnp.float32)
    o_ref[0] = y * s_ref[...] + b_ref[...]


def sepconv_bn_wide(x, dw, pw, scale, shift, relu_in):
    """SeparableConv2d (dw 3x3 + pw 1x1, both bias-free) + BN, fused in one
    kernel.  Returns the 'wide' (N, H, W+2, Cout) layout."""
    N, H, W, Cin = x.shape
    Cout = pw.shape[-1]
    Wp = W + 2
    xf = _flat_pad(x, jnp.bfloat16)
    y = pl.pallas_call(
        functools.partial(_sepconv_flat_kernel, H=H, Wp=Wp, relu_in=relu_in),
        out_shape=jax.ShapeDtypeStruct((N, H * Wp, Cout), jnp.float32),
        grid=(N,),
        in_specs=[
            pl.BlockSpec((1, (H + 3) * Wp, Cin), lambda n: (n, 0, 0)),
            pl.BlockSpec((9, 1, Cin), lambda n: (0, 0, 0)),
            pl.BlockSpec((Cin, Cout), lambda n: (0, 0)),
            pl.BlockSpec((1, Cout), lambda n: (0, 0)),
            pl.BlockSpec((1, Cout), lambda n: (0, 0)),
        ],
        out_specs=pl.BlockSpec((1, H * Wp, Cout), lambda n: (n, 0, 0)),
        compiler_params=_cp(("parallel",)),
    )(xf, dw.reshape(9, 1, Cin).astype(jnp.float32),
      pw.astype(jnp.bfloat16),
      scale.reshape(1, Cout), shift.reshape(1, Cout))
    return y.reshape(N, H, Wp, Cout)


# ---------------------------------------------------------------------------
# Narrow (drop junk columns) + residual add + optional BN+ReLU, fused
# ---------------------------------------------------------------------------

def _finalize_kernel(*refs, W, has_res, has_bn):
    y_ref = refs[0]
    idx = 1
    if has_res:
        res_ref = refs[idx]
        idx += 1
    if has_bn:
        s_ref = refs[idx]
        b_ref = refs[idx + 1]
        idx += 2
    o_ref = refs[idx]

    y = y_ref[0][:, :W, :]
    if has_res:
        y = y + res_ref[0]
    if has_bn:
        y = jnp.maximum(y * s_ref[...] + b_ref[...], 0.0)
    o_ref[0] = y


def finalize(y_wide, W, residual=None, bn=None):
    N, H, Wp, C = y_wide.shape
    has_res = residual is not None
    has_bn = bn is not None
    inputs = [y_wide]
    in_specs = [pl.BlockSpec((1, H, Wp, C), lambda n: (n, 0, 0, 0))]
    if has_res:
        inputs.append(residual)
        in_specs.append(pl.BlockSpec((1, H, W, C), lambda n: (n, 0, 0, 0)))
    if has_bn:
        s, b = bn
        inputs += [s.reshape(1, 1, C), b.reshape(1, 1, C)]
        in_specs += [pl.BlockSpec((1, 1, C), lambda n: (0, 0, 0)),
                     pl.BlockSpec((1, 1, C), lambda n: (0, 0, 0))]
    return pl.pallas_call(
        functools.partial(_finalize_kernel, W=W, has_res=has_res, has_bn=has_bn),
        out_shape=jax.ShapeDtypeStruct((N, H, W, C), jnp.float32),
        grid=(N,),
        in_specs=in_specs,
        out_specs=pl.BlockSpec((1, H, W, C), lambda n: (n, 0, 0, 0)),
        compiler_params=_cp(("parallel",)),
    )(*inputs)


# ---------------------------------------------------------------------------
# 3x3 max-pool, stride 2, pad 1
# ---------------------------------------------------------------------------

def _maxpool3x3_kernel(x_ref, o_ref, *, H, W):
    x = x_ref[0]                                  # (H+2, W+2, C), -inf padded
    m = x[0:H, 0:W, :]
    for dy in range(3):
        for dx in range(3):
            if dy == 0 and dx == 0:
                continue
            m = jnp.maximum(m, x[dy:dy + H, dx:dx + W, :])
    o_ref[0] = m


def maxpool3x3_s2(x):
    N, H, W, C = x.shape
    assert H % 2 == 0 and W % 2 == 0, "maxpool3x3_s2 assumes even H, W"
    xp = jnp.pad(x, ((0, 0), (1, 1), (1, 1), (0, 0)),
                 constant_values=-jnp.inf)
    m = pl.pallas_call(
        functools.partial(_maxpool3x3_kernel, H=H, W=W),
        out_shape=jax.ShapeDtypeStruct((N, H, W, C), jnp.float32),
        grid=(N,),
        in_specs=[pl.BlockSpec((1, H + 2, W + 2, C), lambda n: (n, 0, 0, 0))],
        out_specs=pl.BlockSpec((1, H, W, C), lambda n: (n, 0, 0, 0)),
        compiler_params=_cp(("parallel",)),
    )(xp)
    return m[:, ::2, ::2, :]


# ---------------------------------------------------------------------------
# Module pieces
# ---------------------------------------------------------------------------

def double_conv(x, p):
    W = x.shape[2]
    y = conv3x3_bn_wide(x, p['w1'], p['s1'], p['b1'], relu=True)
    y = conv3x3_bn_wide(y[:, :, :W, :], p['w2'], p['s2'], p['b2'], relu=True)
    return y[:, :, :W, :]


def xception_block(x, p, post=None):
    """parts.Block: [ReLU?] SepConv BN x reps, [MaxPool], + skip.
    `post` = (scale, shift) of a following BatchNorm; if given, BN+ReLU is
    fused into the residual-add epilogue."""
    N, H, W, Cin = x.shape
    inp = x
    stride = p['stride']
    h = x
    h_wide = None
    for i, u in enumerate(p['units']):
        relu_in = p['start_with_relu'] if i == 0 else True
        h_wide = sepconv_bn_wide(h, u['dw'], u['pw'], u['bn_s'], u['bn_b'],
                                 relu_in)
        h = h_wide[:, :, :W, :]

    if stride != 1:
        pooled = maxpool3x3_s2(h)                       # (N, H//2, W//2, Cout)
        Ho, Wo, Cout = pooled.shape[1], pooled.shape[2], pooled.shape[3]
        skip_in = inp[:, ::stride, ::stride, :]         # 1x1 conv w/ stride s
        out = matmul_fused(skip_in.reshape(N * Ho * Wo, Cin), p['skip_w'],
                           p['skip_bn_s'], p['skip_bn_b'],
                           residual=pooled.reshape(N * Ho * Wo, Cout),
                           post=post)
        return out.reshape(N, Ho, Wo, Cout)
    # stride 1 in UXNet always has cin == cout and identity skip:
    # fuse narrow + residual add (+ post BN/ReLU) in one kernel.
    return finalize(h_wide, W, residual=inp, bn=post)


def _interp_matrix(n):
    """2x bilinear upsample matrix, align_corners=True (matches nn.Upsample)."""
    out = 2 * n
    U = np.zeros((out, n), np.float32)
    if n == 1:
        U[:, 0] = 1.0
    else:
        for i in range(out):
            src = i * (n - 1) / (out - 1)
            lo = int(np.floor(src))
            frac = src - lo
            hi = min(lo + 1, n - 1)
            U[i, lo] += 1.0 - frac
            U[i, hi] += frac
    return jnp.asarray(U)


def upsample2x(x):
    N, h, w, C = x.shape
    Uh, Uw = _interp_matrix(h), _interp_matrix(w)
    y = jnp.einsum('ah,nhwc->nawc', Uh, x)
    y = jnp.einsum('bw,nawc->nabc', Uw, y)
    return y


def up_block(x1, x2, p):
    x1u = upsample2x(x1)
    # spatial sizes match exactly at power-of-two resolutions -> F.pad is a no-op
    x = jnp.concatenate([x2, x1u], axis=-1)          # torch.cat([x2, x1], dim=1)
    return double_conv(x, p)


def out_conv(x, w, bias, n_classes):
    """1x1 conv with bias.  The N dim is padded to a lane-dense 128 multiple
    so the kernel writes unmasked full-lane slabs; sliced back outside."""
    N, H, W, Cin = x.shape
    Npad = max(128, ((n_classes + 127) // 128) * 128)
    w_p = jnp.zeros((Cin, Npad), jnp.float32).at[:, :n_classes].set(w)
    b_p = jnp.zeros((Npad,), jnp.float32).at[:n_classes].set(bias)
    s_p = jnp.ones((Npad,), jnp.float32)
    y = matmul_fused(x.reshape(N * H * W, Cin), w_p, s_p, b_p)
    return y[:, :n_classes].reshape(N, H, W, n_classes)


# ---------------------------------------------------------------------------
# Parameter construction (deterministic, synthetic)
# ---------------------------------------------------------------------------

def build_params(key, n_channels, n_classes):
    rng = [key]

    def nk():
        rng[0], sub = jax.random.split(rng[0])
        return sub

    def conv3(cin, cout):
        return jax.random.normal(nk(), (3, 3, cin, cout), jnp.float32) * np.sqrt(2.0 / (9 * cin))

    def conv1(cin, cout):
        return jax.random.normal(nk(), (cin, cout), jnp.float32) * np.sqrt(2.0 / cin)

    def dwconv(c):
        return jax.random.normal(nk(), (9, c), jnp.float32) * np.sqrt(2.0 / 9.0)

    def bn(c):
        # eval-mode BN with default stats: gamma=1, beta=0, mean=0, var=1
        scale = jnp.full((c,), 1.0 / np.sqrt(1.0 + 1e-5), jnp.float32)
        shift = jnp.zeros((c,), jnp.float32)
        return scale, shift

    def dconv_p(cin, cout, mid=None):
        mid = cout if mid is None else mid
        s1, b1 = bn(mid)
        s2, b2 = bn(cout)
        return dict(w1=conv3(cin, mid), s1=s1, b1=b1,
                    w2=conv3(mid, cout), s2=s2, b2=b2)

    def block_p(cin, cout, reps, stride, start_with_relu):
        # grow_first=True in every Block used by UXNet
        units = []
        s, b = bn(cout)
        units.append(dict(dw=dwconv(cin), pw=conv1(cin, cout), bn_s=s, bn_b=b))
        for _ in range(reps - 1):
            s, b = bn(cout)
            units.append(dict(dw=dwconv(cout), pw=conv1(cout, cout), bn_s=s, bn_b=b))
        p = dict(units=units, stride=stride, start_with_relu=start_with_relu)
        if cout != cin or stride != 1:
            ss, sb = bn(cout)
            p.update(skip_w=conv1(cin, cout), skip_bn_s=ss, skip_bn_b=sb)
        return p

    P = {}
    P['inc'] = dconv_p(n_channels, 32)
    P['conv1_w'] = conv3(32, 32)
    P['bn1'] = bn(32)
    P['conv2_w'] = conv3(32, 64)
    P['bn2'] = bn(64)
    P['block1'] = block_p(64, 128, 2, 2, start_with_relu=False)
    P['bn3'] = bn(128)
    P['block2'] = block_p(128, 256, 2, 2, start_with_relu=True)
    P['bn4'] = bn(256)
    P['block3'] = block_p(256, 728, 2, 2, start_with_relu=True)
    for i in range(4, 12):
        P[f'block{i}'] = block_p(728, 728, 3, 1, start_with_relu=True)
    P['bn5'] = bn(728)
    P['up1'] = dconv_p(728 + 256, 364, (728 + 256) // 2)
    P['up2'] = dconv_p(364 + 128, 128, (364 + 128) // 2)
    P['up3'] = dconv_p(128 + 64, 64, (128 + 64) // 2)
    P['up4'] = dconv_p(64 + 32, 64, (64 + 32) // 2)
    P['outc_w'] = conv1(64, n_classes)
    P['outc_b'] = jax.random.normal(nk(), (n_classes,), jnp.float32) * 0.01
    return P


# ---------------------------------------------------------------------------
# Forward pass
# ---------------------------------------------------------------------------

def uxnet_forward(x_nchw, P, n_classes):
    x = jnp.transpose(x_nchw, (0, 2, 3, 1)).astype(jnp.float32)   # NCHW -> NHWC
    _, H, W, _ = x.shape
    assert H % 16 == 0 and W % 16 == 0, "UXNet needs spatial dims divisible by 16"

    x1 = double_conv(x, P['inc'])                                  # (N, S,   S,   32)

    # conv1 is 3x3 stride 2: computed with the stride-1 kernel and subsampled
    # (4x extra MXU work on one small 32-channel layer; avoids im2col).
    y = conv3x3_bn_wide(x1, P['conv1_w'], *P['bn1'], relu=True)
    x2 = y[:, ::2, 0:W:2, :]                                       # (N, S/2, S/2, 32)
    y = conv3x3_bn_wide(x2, P['conv2_w'], *P['bn2'], relu=True)
    x2 = y[:, :, :W // 2, :]                                       # (N, S/2, S/2, 64)

    x3 = xception_block(x2, P['block1'], post=P['bn3'])            # (N, S/4, S/4, 128)
    x4 = xception_block(x3, P['block2'], post=P['bn4'])            # (N, S/8, S/8, 256)
    x5 = xception_block(x4, P['block3'])                           # (N, S/16,S/16,728)
    for i in range(4, 11):
        x5 = xception_block(x5, P[f'block{i}'])
    x5 = xception_block(x5, P['block11'], post=P['bn5'])

    x = up_block(x5, x4, P['up1'])                                 # (N, S/8, S/8, 364)
    x = up_block(x, x3, P['up2'])                                  # (N, S/4, S/4, 128)
    x = up_block(x, x2, P['up3'])                                  # (N, S/2, S/2, 64)
    x = up_block(x, x1, P['up4'])                                  # (N, S,   S,   64)

    logits = out_conv(x, P['outc_w'], P['outc_b'], n_classes)
    return jnp.transpose(logits, (0, 3, 1, 2))                     # NHWC -> NCHW


# ---------------------------------------------------------------------------
if __name__ == "__main__":
    n_channels, n_classes = 4, 3
    batch, S = 2, 16

    key = jax.random.PRNGKey(0)
    pkey, xkey = jax.random.split(key)
    params = build_params(pkey, n_channels, n_classes)
    x = jax.random.normal(xkey, (batch, n_channels, S, S), jnp.float32)

    logits = uxnet_forward(x, params, n_classes)
    logits = jax.block_until_ready(logits)

    assert logits.shape == (batch, n_classes, S, S), logits.shape
    assert logits.dtype == jnp.float32
    assert bool(jnp.all(jnp.isfinite(logits)))
    print("KERNEL_OK")
</pallas_src>

<mosaic_0001>
module attributes {stable_mosaic.version = 11 : i64} {
  func.func @_conv3x3_flat_kernel(%arg0: i32, %arg1: memref<1x342x4xf32, #tpu.memory_space<vmem>>, %arg2: memref<9x4x32xbf16, #tpu.memory_space<vmem>>, %arg3: memref<1x32xf32, #tpu.memory_space<vmem>>, %arg4: memref<1x32xf32, #tpu.memory_space<vmem>>, %arg5: memref<1x288x32xf32, #tpu.memory_space<vmem>>) attributes {dimension_semantics = [#tpu.dimension_semantics<parallel>], iteration_bounds = array<i64: 2>, scalar_prefetch = 0 : i64, scratch_operands = 0 : i64, tpu.core_type = #tpu.core_type<tc>, window_params = [{transform_indices = @transform_0, window_bounds = array<i64: 1, 342, 4>}, {pipeline_mode = #tpu.pipeline_mode<synchronous>, transform_indices = @transform_1, window_bounds = array<i64: 9, 4, 32>}, {pipeline_mode = #tpu.pipeline_mode<synchronous>, transform_indices = @transform_2, window_bounds = array<i64: 1, 32>}, {pipeline_mode = #tpu.pipeline_mode<synchronous>, transform_indices = @transform_3, window_bounds = array<i64: 1, 32>}, {transform_indices = @transform_4, window_bounds = array<i64: 1, 288, 32>}]} {
    %c0 = arith.constant 0 : index
    %c0_0 = arith.constant 0 : index
    %c0_1 = arith.constant 0 : index
    %0 = vector.load %arg1[%c0, %c0_0, %c0_1] : memref<1x342x4xf32, #tpu.memory_space<vmem>>, vector<1x342x4xf32>
    %1 = vector.shape_cast %0 : vector<1x342x4xf32> to vector<342x4xf32>
    %cst = arith.constant 0.000000e+00 : f32
    %2 = vector.broadcast %cst : f32 to vector<288x32xf32>
    %3 = vector.extract_strided_slice %1 {offsets = [0, 0], sizes = [288, 4], strides = [1, 1]} : vector<342x4xf32> to vector<288x4xf32>
    %4 = arith.truncf %3 : vector<288x4xf32> to vector<288x4xbf16>
    %c0_2 = arith.constant 0 : index
    %c0_3 = arith.constant 0 : index
    %c0_4 = arith.constant 0 : index
    %5 = vector.load %arg2[%c0_2, %c0_3, %c0_4] : memref<9x4x32xbf16, #tpu.memory_space<vmem>>, vector<1x4x32xbf16>
    %6 = vector.shape_cast %5 : vector<1x4x32xbf16> to vector<4x32xbf16>
    %cst_5 = arith.constant dense<0.000000e+00> : vector<288x32xf32>
    %7 = tpu.matmul %4, %6, %cst_5 {dimension_numbers = #tpu.dot_dimension_numbers<[1], [0], [0], [1], [0, 0, 1, 1], [], []>} : vector<288x4xbf16>, vector<4x32xbf16>, vector<288x32xf32> -> vector<288x32xf32>
    %8 = arith.addf %2, %7 : vector<288x32xf32>
    %9 = vector.extract_strided_slice %1 {offsets = [1, 0], sizes = [288, 4], strides = [1, 1]} : vector<342x4xf32> to vector<288x4xf32>
    %10 = arith.truncf %9 : vector<288x4xf32> to vector<288x4xbf16>
    %c1 = arith.constant 1 : index
    %c0_6 = arith.constant 0 : index
    %c0_7 = arith.constant 0 : index
    %11 = vector.load %arg2[%c1, %c0_6, %c0_7] : memref<9x4x32xbf16, #tpu.memory_space<vmem>>, vector<1x4x32xbf16>
    %12 = vector.shape_cast %11 : vector<1x4x32xbf16> to vector<4x32xbf16>
    %cst_8 = arith.constant dense<0.000000e+00> : vector<288x32xf32>
    %13 = tpu.matmul %10, %12, %cst_8 {dimension_numbers = #tpu.dot_dimension_numbers<[1], [0], [0], [1], [0, 0, 1, 1], [], []>} : vector<288x4xbf16>, vector<4x32xbf16>, vector<288x32xf32> -> vector<288x32xf32>
    %14 = arith.addf %8, %13 : vector<288x32xf32>
    %15 = vector.extract_strided_slice %1 {offsets = [2, 0], sizes = [288, 4], strides = [1, 1]} : vector<342x4xf32> to vector<288x4xf32>
    %16 = arith.truncf %15 : vector<288x4xf32> to vector<288x4xbf16>
    %c2 = arith.constant 2 : index
    %c0_9 = arith.constant 0 : index
    %c0_10 = arith.constant 0 : index
    %17 = vector.load %arg2[%c2, %c0_9, %c0_10] : memref<9x4x32xbf16, #tpu.memory_space<vmem>>, vector<1x4x32xbf16>
    %18 = vector.shape_cast %17 : vector<1x4x32xbf16> to vector<4x32xbf16>
    %cst_11 = arith.constant dense<0.000000e+00> : vector<288x32xf32>
    %19 = tpu.matmul %16, %18, %cst_11 {dimension_numbers = #tpu.dot_dimension_numbers<[1], [0], [0], [1], [0, 0, 1, 1], [], []>} : vector<288x4xbf16>, vector<4x32xbf16>, vector<288x32xf32> -> vector<288x32xf32>
    %20 = arith.addf %14, %19 : vector<288x32xf32>
    %21 = vector.extract_strided_slice %1 {offsets = [18, 0], sizes = [288, 4], strides = [1, 1]} : vector<342x4xf32> to vector<288x4xf32>
    %22 = arith.truncf %21 : vector<288x4xf32> to vector<288x4xbf16>
    %c3 = arith.constant 3 : index
    %c0_12 = arith.constant 0 : index
    %c0_13 = arith.constant 0 : index
    %23 = vector.load %arg2[%c3, %c0_12, %c0_13] : memref<9x4x32xbf16, #tpu.memory_space<vmem>>, vector<1x4x32xbf16>
    %24 = vector.shape_cast %23 : vector<1x4x32xbf16> to vector<4x32xbf16>
    %cst_14 = arith.constant dense<0.000000e+00> : vector<288x32xf32>
    %25 = tpu.matmul %22, %24, %cst_14 {dimension_numbers = #tpu.dot_dimension_numbers<[1], [0], [0], [1], [0, 0, 1, 1], [], []>} : vector<288x4xbf16>, vector<4x32xbf16>, vector<288x32xf32> -> vector<288x32xf32>
    %26 = arith.addf %20, %25 : vector<288x32xf32>
    %27 = vector.extract_strided_slice %1 {offsets = [19, 0], sizes = [288, 4], strides = [1, 1]} : vector<342x4xf32> to vector<288x4xf32>
    %28 = arith.truncf %27 : vector<288x4xf32> to vector<288x4xbf16>
    %c4 = arith.constant 4 : index
    %c0_15 = arith.constant 0 : index
    %c0_16 = arith.constant 0 : index
    %29 = vector.load %arg2[%c4, %c0_15, %c0_16] : memref<9x4x32xbf16, #tpu.memory_space<vmem>>, vector<1x4x32xbf16>
    %30 = vector.shape_cast %29 : vector<1x4x32xbf16> to vector<4x32xbf16>
    %cst_17 = arith.constant dense<0.000000e+00> : vector<288x32xf32>
    %31 = tpu.matmul %28, %30, %cst_17 {dimension_numbers = #tpu.dot_dimension_numbers<[1], [0], [0], [1], [0, 0, 1, 1], [], []>} : vector<288x4xbf16>, vector<4x32xbf16>, vector<288x32xf32> -> vector<288x32xf32>
    %32 = arith.addf %26, %31 : vector<288x32xf32>
    %33 = vector.extract_strided_slice %1 {offsets = [20, 0], sizes = [288, 4], strides = [1, 1]} : vector<342x4xf32> to vector<288x4xf32>
    %34 = arith.truncf %33 : vector<288x4xf32> to vector<288x4xbf16>
    %c5 = arith.constant 5 : index
    %c0_18 = arith.constant 0 : index
    %c0_19 = arith.constant 0 : index
    %35 = vector.load %arg2[%c5, %c0_18, %c0_19] : memref<9x4x32xbf16, #tpu.memory_space<vmem>>, vector<1x4x32xbf16>
    %36 = vector.shape_cast %35 : vector<1x4x32xbf16> to vector<4x32xbf16>
    %cst_20 = arith.constant dense<0.000000e+00> : vector<288x32xf32>
    %37 = tpu.matmul %34, %36, %cst_20 {dimension_numbers = #tpu.dot_dimension_numbers<[1], [0], [0], [1], [0, 0, 1, 1], [], []>} : vector<288x4xbf16>, vector<4x32xbf16>, vector<288x32xf32> -> vector<288x32xf32>
    %38 = arith.addf %32, %37 : vector<288x32xf32>
    %39 = vector.extract_strided_slice %1 {offsets = [36, 0], sizes = [288, 4], strides = [1, 1]} : vector<342x4xf32> to vector<288x4xf32>
    %40 = arith.truncf %39 : vector<288x4xf32> to vector<288x4xbf16>
    %c6 = arith.constant 6 : index
    %c0_21 = arith.constant 0 : index
    %c0_22 = arith.constant 0 : index
    %41 = vector.load %arg2[%c6, %c0_21, %c0_22] : memref<9x4x32xbf16, #tpu.memory_space<vmem>>, vector<1x4x32xbf16>
    %42 = vector.shape_cast %41 : vector<1x4x32xbf16> to vector<4x32xbf16>
    %cst_23 = arith.constant dense<0.000000e+00> : vector<288x32xf32>
    %43 = tpu.matmul %40, %42, %cst_23 {dimension_numbers = #tpu.dot_dimension_numbers<[1], [0], [0], [1], [0, 0, 1, 1], [], []>} : vector<288x4xbf16>, vector<4x32xbf16>, vector<288x32xf32> -> vector<288x32xf32>
    %44 = arith.addf %38, %43 : vector<288x32xf32>
    %45 = vector.extract_strided_slice %1 {offsets = [37, 0], sizes = [288, 4], strides = [1, 1]} : vector<342x4xf32> to vector<288x4xf32>
    %46 = arith.truncf %45 : vector<288x4xf32> to vector<288x4xbf16>
    %c7 = arith.constant 7 : index
    %c0_24 = arith.constant 0 : index
    %c0_25 = arith.constant 0 : index
    %47 = vector.load %arg2[%c7, %c0_24, %c0_25] : memref<9x4x32xbf16, #tpu.memory_space<vmem>>, vector<1x4x32xbf16>
    %48 = vector.shape_cast %47 : vector<1x4x32xbf16> to vector<4x32xbf16>
    %cst_26 = arith.constant dense<0.000000e+00> : vector<288x32xf32>
    %49 = tpu.matmul %46, %48, %cst_26 {dimension_numbers = #tpu.dot_dimension_numbers<[1], [0], [0], [1], [0, 0, 1, 1], [], []>} : vector<288x4xbf16>, vector<4x32xbf16>, vector<288x32xf32> -> vector<288x32xf32>
    %50 = arith.addf %44, %49 : vector<288x32xf32>
    %51 = vector.extract_strided_slice %1 {offsets = [38, 0], sizes = [288, 4], strides = [1, 1]} : vector<342x4xf32> to vector<288x4xf32>
    %52 = arith.truncf %51 : vector<288x4xf32> to vector<288x4xbf16>
    %c8 = arith.constant 8 : index
    %c0_27 = arith.constant 0 : index
    %c0_28 = arith.constant 0 : index
    %53 = vector.load %arg2[%c8, %c0_27, %c0_28] : memref<9x4x32xbf16, #tpu.memory_space<vmem>>, vector<1x4x32xbf16>
    %54 = vector.shape_cast %53 : vector<1x4x32xbf16> to vector<4x32xbf16>
    %cst_29 = arith.constant dense<0.000000e+00> : vector<288x32xf32>
    %55 = tpu.matmul %52, %54, %cst_29 {dimension_numbers = #tpu.dot_dimension_numbers<[1], [0], [0], [1], [0, 0, 1, 1], [], []>} : vector<288x4xbf16>, vector<4x32xbf16>, vector<288x32xf32> -> vector<288x32xf32>
    %56 = arith.addf %50, %55 : vector<288x32xf32>
    %c0_30 = arith.constant 0 : index
    %c0_31 = arith.constant 0 : index
    %57 = vector.load %arg3[%c0_30, %c0_31] : memref<1x32xf32, #tpu.memory_space<vmem>>, vector<1x32xf32>
    %58 = vector.broadcast %57 : vector<1x32xf32> to vector<288x32xf32>
    %59 = arith.mulf %56, %58 : vector<288x32xf32>
    %c0_32 = arith.constant 0 : index
    %c0_33 = arith.constant 0 : index
    %60 = vector.load %arg4[%c0_32, %c0_33] : memref<1x32xf32, #tpu.memory_space<vmem>>, vector<1x32xf32>
    %61 = vector.broadcast %60 : vector<1x32xf32> to vector<288x32xf32>
    %62 = arith.addf %59, %61 : vector<288x32xf32>
    %cst_34 = arith.constant 0.000000e+00 : f32
    %63 = vector.broadcast %cst_34 : f32 to vector<288x32xf32>
    %64 = arith.maximumf %62, %63 : vector<288x32xf32>
    %c0_35 = arith.constant 0 : index
    %c0_36 = arith.constant 0 : index
    %c0_37 = arith.constant 0 : index
    %65 = vector.load %arg5[%c0_35, %c0_36, %c0_37] : memref<1x288x32xf32, #tpu.memory_space<vmem>>, vector<1x288x32xf32>
    %66 = vector.shape_cast %65 : vector<1x288x32xf32> to vector<288x32xf32>
    %67 = vector.shape_cast %64 : vector<288x32xf32> to vector<1x288x32xf32>
    tpu.vector_store %arg5[%c0_35, %c0_36, %c0_37], %67 {strides = array<i32>} : memref<1x288x32xf32, #tpu.memory_space<vmem>>, vector<1x288x32xf32>,
    return
  }
  func.func @transform_0(%arg0: i32) -> (i32, i32, i32) {
    %c0_i32 = arith.constant 0 : i32
    %c0_i32_0 = arith.constant 0 : i32
    %c0_i32_1 = arith.constant 0 : i32
    return %arg0, %c0_i32, %c0_i32_0 : i32, i32, i32
  }
  func.func @transform_1(%arg0: i32) -> (i32, i32, i32) {
    %c0_i32 = arith.constant 0 : i32
    %c0_i32_0 = arith.constant 0 : i32
    %c0_i32_1 = arith.constant 0 : i32
    %c0_i32_2 = arith.constant 0 : i32
    return %c0_i32, %c0_i32_0, %c0_i32_1 : i32, i32, i32
  }
  func.func @transform_2(%arg0: i32) -> (i32, i32) {
    %c0_i32 = arith.constant 0 : i32
    %c0_i32_0 = arith.constant 0 : i32
    %c0_i32_1 = arith.constant 0 : i32
    return %c0_i32, %c0_i32_0 : i32, i32
  }
  func.func @transform_3(%arg0: i32) -> (i32, i32) {
    %c0_i32 = arith.constant 0 : i32
    %c0_i32_0 = arith.constant 0 : i32
    %c0_i32_1 = arith.constant 0 : i32
    return %c0_i32, %c0_i32_0 : i32, i32
  }
  func.func @transform_4(%arg0: i32) -> (i32, i32, i32) {
    %c0_i32 = arith.constant 0 : i32
    %c0_i32_0 = arith.constant 0 : i32
    %c0_i32_1 = arith.constant 0 : i32
    return %arg0, %c0_i32, %c0_i32_0 : i32, i32, i32
  }
}

</mosaic_0001>

<bundles_post_ra>
// kernel: tpu_custom_call.1
= control target key start
LH: loop header
LB: loop body
LE: loop exit
PB: predicated region body
PF: predicated region fallthrough
CT: control target
= control target key end

     0   :  { %s4243_s15 = smov 0   ;;  %s5379_s0 = inlined_call_operand.vmem [shape: f32[2,342,4], index: 0, kind: input, shape index: {}]   ;;  %s5380_s1 = inlined_call_operand.vmem [shape: bf16[9,4,32], index: 1, kind: input, shape index: {}]   ;;  %s5381_s2 = inlined_call_operand.vmem [shape: f32[1,32], index: 2, kind: input, shape index: {}]   ;;  %s5382_s3 = inlined_call_operand.vmem [shape: f32[1,32], index: 3, kind: input, shape index: {}]   ;;  %s5383_s4 = inlined_call_operand.vmem [shape: f32[2,288,32], index: 4, kind: output, shape index: {}]  }
   0x1 LB: > { %s3206_s16 = sadd.s32 4294967295, %s4216_s15   ;;  %p3210_p0 = scmp.ge.s32.totalorder %s4216_s15, 1  ;;  %s4216_s15 = sphi %s4243_s15, %s14_s15  }
   0x2   : > { %p162_p1 = scmp.lt.s32.totalorder %s4216_s15, 3 }
   0x4   : > { %p163_p2 = pnand %p3210_p0, %p162_p1 }
   0x6   : > { %166 = sbr.rel (%p163_p2) target bundleno = 576 (0x240), region = 36 }
   0xd   : > { %vm466_vm0 = vcmask 1041408   ;;  %v4254_v0 = vld [vmem:[%s5380_s1 + $0x8] sm:$0x3]  ;;  %v3213_v1 = vld [vmem:[%s5380_s1 + $0x2] sm:$0x3]  ;;  %p188_p3 = scmp.lt.s32.totalorder %s3206_s16, 1 }
   0xe   : > { %5416 = vst [vmem:[#allocation2_spill] sm:$0xff] %v4254_v0  ;;  %4194 = vmatprep.subr.msk.bf16.mxu0 %vm466_vm0, %v4254_v0  ;;  %4190 = vmatprep.subr.msk.bf16.mxu1 %vm466_vm0, %v3213_v1  ;;  %v4264_v2 = vsel %vm466_vm0, %v4254_v0, 0  ;;  %v468_v3 = vsel %vm466_vm0, %v3213_v1, 0  ;;  %v3307_v4 = vld [vmem:[%s5380_s1 + $0xa] sm:$0x3]  ;;  %vm411_vm2 = vcmask 31744  }
   0xf   : > { %5417 = vst [vmem:[#allocation3_spill] sm:$0xff] %v4264_v2  ;;  %3711 = vmatpush3.bf16.msra.mxu0 %v4264_v2  ;;  %3559 = vmatpush3.bf16.msra.mxu1 %v468_v3  ;;  %s5455_s16 = smov (!%p188_p3, %s3206_s16), 1  ;;  %v258_v5 = vld [vmem:[%s5380_s1] sm:$0x3]  ;;  %vm262_vm1 = vsmask.f32 7424 }
  0x10   : > { %4196 = vmatprep.subr.msk.bf16.mxu0 %vm466_vm0, %v3307_v4  ;;  %s4200_s25 = smul.u32 344, %s5455_s16  ;;  %4191 = vmatprep.subr.msk.bf16.mxu1 %vm466_vm0, %v258_v5  ;;  %vm1426_vm3 = vsmask.f32 6400  ;;  %v1877_v17 = vsel %vm466_vm0, %v3307_v4, 0  ;;  %v684_v23 = vsel %vm466_vm0, %v258_v5, 0  ;;  %vm1784_vm4 = vcmask 1045504  }
  0x11   : > { %v4353_v62 = vld [vmem:[%s5380_s1 + $0x4] sm:$0x3]  ;;  %vm2326_vm5 = vsmask.f32 5376  ;;  %vm884_vm6 = vcmask 1046528   ;;  %vm2684_vm7 = vcmask 1044480  }
  0x12   : > { %s4282_s28 = scalar_lea.vmem %s5379_s0, %s4200_s25  ;;  %s4201_s17 = smul.u32 288, %s5455_s16  ;;  %vm3114_vm8 = vcmask 261120  }
  0x13   : > { %v199_v6 = vld [vmem:[%s4282_s28] sm:$0xff]  ;;  %v200_v7 = vld [vmem:[%s4282_s28 + $0x8] sm:$0xff]  ;;  %v201_v8 = vld [vmem:[%s4282_s28 + $0x10] sm:$0xff] }
  0x14   : > { %v202_v9 = vld [vmem:[%s4282_s28 + $0x18] sm:$0xff]  ;;  %v4288_v10 = vpack.c.bf16 %v200_v7, %v199_v6  ;;  %v203_v11 = vld [vmem:[%s4282_s28 + $0x20] sm:$0xff]  ;;  %v204_v12 = vld [vmem:[%s4282_s28 + $0x28] sm:$0xff]  ;;  %s5223_s21 = scalar_lea.vmem %s5383_s4, %s4201_s17 }
  0x15   : > { %v4292_v13 = vpack.c.bf16 %v202_v9, %v201_v8  ;;  %v4294_v14 = vpack.c.bf16 %v204_v12, %v203_v11  ;;  %v205_v15 = vld [vmem:[%s4282_s28 + $0x30] sm:$0xff]  ;;  %v206_v16 = vld [vmem:[%s4282_s28 + $0x38] sm:$0xff]  ;;  %v207_v18 = vld [vmem:[%s4282_s28 + $0x40] sm:$0xff] }
  0x16   : > { %v264_v19 = vshrl.u32 %v4288_v10, 16  ;;  %v266_v20 = vshll.u32 %v4288_v10, 16  ;;  %v4302_v21 = vpack.c.bf16 %v206_v16, %v205_v15  ;;  %v208_v22 = vld [vmem:[%s4282_s28 + $0x48] sm:$0xff]  ;;  %v209_v44 = vld [vmem:[%s4282_s28 + $0x50] sm:$0xff]  ;;  %v210_v49 = vld [vmem:[%s4282_s28 + $0x58] sm:$0xff] }
  0x17   : > { %v271_v24 = vshll.u32 %v4292_v13, 16  ;;  %v275_v25 = vshrl.u32 %v4292_v13, 16  ;;  %v4309_v26 = vshll.u32 %v4294_v14, 16  ;;  %v4312_v27 = vshrl.u32 %v4294_v14, 16  ;;  %v211_v50 = vld [vmem:[%s4282_s28 + $0x60] sm:$0xff]  ;;  %v212_v51 = vld [vmem:[%s4282_s28 + $0x68] sm:$0xff] }
  0x18   : > { %v268_v28 = vrot.slane %v266_v20, 1  ;;  %v4315_v29 = vshll.u32 %v4302_v21, 16  ;;  %v4318_v30 = vshrl.u32 %v4302_v21, 16  ;;  %v4320_v31 = vpack.c.bf16 %v208_v22, %v207_v18  ;;  %v213_v56 = vld [vmem:[%s4282_s28 + $0x70] sm:$0xff]  ;;  %v214_v57 = vld [vmem:[%s4282_s28 + $0x78] sm:$0xff]  ;;  %v215_v5 = vld [vmem:[%s4282_s28 + $0x80] sm:$0xff] }
  0x19   : > { %v273_v32 = vrot.slane %v271_v24, 1  ;;  %v1427_v33 = vrot.slane %v275_v25, 1  ;;  %v1428_v34 = vrot.slane %v271_v24, 2  ;;  %v1430_v35 = vrot.slane %v4312_v27, 1  ;;  %v216_v6 = vld [vmem:[%s4282_s28 + $0x88] sm:$0xff] }
  0x1a   : > { %v269_v36 = vor.u32 %v268_v28, %v264_v19  ;;  %v1431_v37 = vrot.slane %v4309_v26, 2  ;;  %v281_v38 = vrot.slane %v4309_v26, 1  ;;  %v1434_v39 = vrot.slane %v4318_v30, 1  ;;  %v4368_v7 = vld [vmem:[%s5380_s1 + $0xc] sm:$0x3] }
  0x1b   : > { %v277_v40 = vor.u32 %v275_v25, %v273_v32  ;;  %v1429_v41 = vor.u32 %v1428_v34, %v1427_v33  ;;  %v1435_v42 = vrot.slane %v4315_v29, 2  ;;  %v289_v43 = vrot.slane %v4315_v29, 1 }
  0x1c   : > { %v274_v45 = vsel %vm262_vm1, %v269_v36, %v273_v32  ;;  %v1432_v46 = vor.u32 %v1431_v37, %v1430_v35  ;;  %v285_v47 = vor.u32 %v4312_v27, %v281_v38  ;;  %v4332_v48 = vshll.u32 %v4320_v31, 16 }
  0x1d   : > { %3560 = vmatprep.mubr.msk.bf16.mxu1 %vm411_vm2, %v274_v45  ;;  %v282_v52 = vsel %vm262_vm1, %v277_v40, %v281_v38  ;;  %v1436_v53 = vor.u32 %v1435_v42, %v1434_v39  ;;  %v4340_v54 = vshrl.u32 %v4320_v31, 16  ;;  %v293_v55 = vor.u32 %v4318_v30, %v289_v43  ;;  %v218_v42 = vld [vmem:[%s4282_s28 + $0x98] sm:$0xff] }
  0x1e   : > { %v1433_v58 = vsel %vm1426_vm3, %v1429_v41, %v1432_v46  ;;  %3561 = vmatmul.mubr.msk.bf16.vlgmr.msra.gmra.mrb[0].mxu1 %vm411_vm2, %v282_v52  ;;  %v290_v59 = vsel %vm262_vm1, %v285_v47, %v289_v43  ;;  %v1439_v60 = vrot.slane %v4332_v48, 2  ;;  %v297_v61 = vrot.slane %v4332_v48, 1  ;;  %v217_v41 = vld [vmem:[%s4282_s28 + $0x90] sm:$0xff]  ;;  %v220_v47 = vld [vmem:[%s4282_s28 + $0xa8] sm:$0xff] }
  0x1f   : > { %3712 = vmatprep.mubr.msk.bf16.mxu0 %vm411_vm2, %v1433_v58  ;;  %v1437_v63 = vsel %vm1426_vm3, %v1432_v46, %v1436_v53  ;;  %3564 = vmatprep.mubr.msk.bf16.mxu1 %vm411_vm2, %v290_v59  ;;  %v1438_v1 = vrot.slane %v4340_v54, 1  ;;  %v4359_v3 = vpack.c.bf16 %v210_v49, %v209_v44  ;;  %v4361_v4 = vpack.c.bf16 %v212_v51, %v211_v50  ;;  %v219_v46 = vld [vmem:[%s4282_s28 + $0xa0] sm:$0xff]  ;;  %v221_v58 = vld [vmem:[%s4282_s28 + $0xb0] sm:$0xff]  ;;  %v222_v59 = vld [vmem:[%s4282_s28 + $0xb8] sm:$0xff] }
  0x20   : > { %3713 = vmatmul.mubr.msk.bf16.vlgmr.msra.gmra.mrb[0].mxu0 %vm411_vm2, %v1437_v63  ;;  %v298_v8 = vsel %vm262_vm1, %v293_v55, %v297_v61  ;;  %3597 = vmatpush3.bf16.msra.mxu1 %v684_v23  ;;  %v301_v9 = vor.u32 %v4340_v54, %v297_v61  ;;  %v4373_v11 = vpack.c.bf16 %v214_v57, %v213_v56 }
  0x21   : > { %3749 = vmatpush3.bf16.msra.mxu0 %v1877_v17  ;;  %v1440_v12 = vor.u32 %v1439_v60, %v1438_v1  ;;  %v4376_v15 = vshll.u32 %v4359_v3, 16  ;;  %v4379_v16 = vshrl.u32 %v4359_v3, 16  ;;  %v4382_v18 = vshll.u32 %v4361_v4, 16  ;;  %4192 = vmatprep.subr.msk.bf16.mxu1 %vm466_vm0, %v4353_v62 }
  0x22   : > { %v4387_v19 = vshrl.u32 %v4361_v4, 16  ;;  %v4390_v20 = vshll.u32 %v4373_v11, 16  ;;  %v4393_v17 = vshrl.u32 %v4373_v11, 16  ;;  %v4395_v22 = vpack.c.bf16 %v216_v6, %v215_v5  ;;  %4197 = vmatprep.subr.msk.bf16.mxu0 %vm466_vm0, %v4368_v7 }
  0x23   : > { %v1441_v23 = vsel %vm1426_vm3, %v1436_v53, %v1440_v12  ;;  %v1442_v24 = vrot.slane %v4379_v16, 1  ;;  %v1443_v25 = vrot.slane %v4376_v15, 2  ;;  %v305_v28 = vrot.slane %v4376_v15, 1 }
  0x24   : > { %3716 = vmatprep.mubr.msk.bf16.mxu0 %vm411_vm2, %v1441_v23  ;;  %v1446_v32 = vrot.slane %v4387_v19, 1  ;;  %v1447_v33 = vrot.slane %v4382_v18, 2  ;;  %v1450_v36 = vrot.slane %v4393_v17, 1  ;;  %v1451_v37 = vrot.slane %v4390_v20, 2 }
  0x25   : > { %v1444_v34 = vor.u32 %v1443_v25, %v1442_v24  ;;  %v306_v35 = vsel %vm262_vm1, %v301_v9, %v305_v28  ;;  %v313_v39 = vrot.slane %v4382_v18, 1  ;;  %v4412_v40 = vshll.u32 %v4395_v22, 16 }
  0x26   : > { %3565 = vmatmul.mubr.msk.bf16.gmra.mrb[4].mxu1 %vm411_vm2, %v298_v8  ;;  %v1448_v38 = vor.u32 %v1447_v33, %v1446_v32  ;;  %v309_v44 = vor.u32 %v4379_v16, %v305_v28  ;;  %v4420_v45 = vshrl.u32 %v4395_v22, 16  ;;  %v321_v51 = vrot.slane %v4390_v20, 1 }
  0x27   : > { %v1445_v43 = vsel %vm1426_vm3, %v1440_v12, %v1444_v34  ;;  %3568 = vmatprep.mubr.msk.bf16.mxu1 %vm411_vm2, %v306_v35  ;;  %v317_v50 = vor.u32 %v4387_v19, %v313_v39  ;;  %v1455_v52 = vrot.slane %v4412_v40, 2  ;;  %v1452_v53 = vor.u32 %v1451_v37, %v1450_v36 }
  0x28   : > { %3717 = vmatmul.mubr.msk.bf16.gmra.mrb[4].mxu0 %vm411_vm2, %v1445_v43  ;;  %v1449_v49 = vsel %vm1426_vm3, %v1444_v34, %v1448_v38  ;;  %v1454_v55 = vrot.slane %v4420_v45, 1  ;;  %v4431_v56 = vpack.c.bf16 %v218_v42, %v217_v41  ;;  %v4433_v57 = vpack.c.bf16 %v220_v47, %v219_v46  ;;  %v223_v43 = vld [vmem:[%s4282_s28 + $0xc0] sm:$0xff]  ;;  %v225_v47 = vld [vmem:[%s4282_s28 + $0xd0] sm:$0xff] }
  0x29   : > { %3720 = vmatprep.mubr.msk.bf16.mxu0 %vm411_vm2, %v1449_v49  ;;  %v314_v60 = vsel %vm262_vm1, %v309_v44, %v313_v39  ;;  %v322_v5 = vsel %vm262_vm1, %v317_v50, %v321_v51  ;;  %v1453_v9 = vsel %vm1426_vm3, %v1448_v38, %v1452_v53  ;;  %v4454_v24 = vpack.c.bf16 %v222_v59, %v221_v58  ;;  %v224_v44 = vld [vmem:[%s4282_s28 + $0xc8] sm:$0xff]  ;;  %v234_v58 = vld [vmem:[%s4282_s28 + $0x118] sm:$0xff] }
  0x2a   : > { %v1456_v61 = vor.u32 %v1455_v52, %v1454_v55  ;;  %v4439_v63 = vshll.u32 %v4431_v56, 16  ;;  %v4442_v1 = vshrl.u32 %v4431_v56, 16  ;;  %v4446_v6 = vshll.u32 %v4433_v57, 16  ;;  %v233_v55 = vld [vmem:[%s4282_s28 + $0x110] sm:$0xff] }
  0x2b   : > { %v4449_v8 = vshrl.u32 %v4433_v57, 16  ;;  %v329_v28 = vrot.slane %v4412_v40, 1  ;;  %v325_v34 = vor.u32 %v4393_v17, %v321_v51  ;;  %v4468_v38 = vshll.u32 %v4454_v24, 16 }
  0x2c   : > { %v1458_v12 = vrot.slane %v4442_v1, 1  ;;  %v1459_v23 = vrot.slane %v4439_v63, 2  ;;  %v1457_v25 = vsel %vm1426_vm3, %v1452_v53, %v1456_v61  ;;  %v1463_v33 = vrot.slane %v4446_v6, 2  ;;  %v226_v53 = vld [vmem:[%s4282_s28 + $0xd8] sm:$0xff] }
  0x2d   : > { %v1462_v32 = vrot.slane %v4449_v8, 1  ;;  %v333_v35 = vor.u32 %v4420_v45, %v329_v28  ;;  %v337_v36 = vrot.slane %v4439_v63, 1  ;;  %v4471_v39 = vshrl.u32 %v4454_v24, 16 }
  0x2e   : > { %3569 = vmatmul.mubr.msk.bf16.gmra.mrb[8].mxu1 %vm411_vm2, %v314_v60  ;;  %v1460_v37 = vor.u32 %v1459_v23, %v1458_v12  ;;  %v330_v42 = vsel %vm262_vm1, %v325_v34, %v329_v28  ;;  %v345_v50 = vrot.slane %v4446_v6, 1  ;;  %v1467_v52 = vrot.slane %v4468_v38, 2  ;;  %v235_v28 = vld [vmem:[%s4282_s28 + $0x120] sm:$0xff] }
  0x2f   : > { %3572 = vmatprep.mubr.msk.bf16.mxu1 %vm411_vm2, %v322_v5  ;;  %v1464_v41 = vor.u32 %v1463_v33, %v1462_v32  ;;  %v338_v46 = vsel %vm262_vm1, %v333_v35, %v337_v36  ;;  %v1466_v51 = vrot.slane %v4471_v39, 1  ;;  %v4487_v60 = vpack.c.bf16 %v224_v44, %v223_v43 }
  0x30   : > { %3721 = vmatmul.mubr.msk.bf16.gmra.mrb[8].mxu0 %vm411_vm2, %v1453_v9  ;;  %v1461_v49 = vsel %vm1426_vm3, %v1456_v61, %v1460_v37  ;;  %v341_v61 = vor.u32 %v4442_v1, %v337_v36  ;;  %v349_v5 = vor.u32 %v4449_v8, %v345_v50  ;;  %v353_v9 = vrot.slane %v4468_v38, 1 }
  0x31   : > { %3724 = vmatprep.mubr.msk.bf16.mxu0 %vm411_vm2, %v1457_v25  ;;  %v1465_v59 = vsel %vm1426_vm3, %v1460_v37, %v1464_v41  ;;  %v4494_v12 = vpack.c.bf16 %v226_v53, %v225_v47  ;;  %v4496_v23 = vpack.c.bf16 %v234_v58, %v233_v55  ;;  %v4499_v25 = vor.u32 %v1467_v52, %v1466_v51  ;;  %v227_v37 = vld [vmem:[%s4282_s28 + $0xe0] sm:$0xff]  ;;  %v229_v51 = vld [vmem:[%s4282_s28 + $0xf0] sm:$0xff]  ;;  %v230_v52 = vld [vmem:[%s4282_s28 + $0xf8] sm:$0xff] }
  0x32   : > { %v1785_v32 = vrot.slane %v4292_v13, 2  ;;  %v1786_v33 = vrot.slane %v4294_v14, 2  ;;  %v4505_v34 = vshll.u32 %v4487_v60, 16  ;;  %v346_v35 = vsel %vm262_vm1, %v341_v61, %v345_v50 }
  0x33   : > { %5418 = vst [vmem:[#allocation4_spill] sm:$0xff] %v4499_v25  ;;  %v354_v36 = vsel %vm262_vm1, %v349_v5, %v353_v9  ;;  %v4512_v43 = vshll.u32 %v4496_v23, 16  ;;  %v4515_v44 = vshrl.u32 %v4487_v60, 16  ;;  %v4520_v47 = vpack.c.bf16 %v235_v28, %v235_v28 }
  0x34   : > { %5419 = vst [vmem:[#allocation5_spill] sm:$0xff] %v4505_v34  ;;  %v1469_v50 = vsel %vm1426_vm3, %v1464_v41, %v4499_v25  ;;  %v1787_v55 = vsel %vm1784_vm4, %v1785_v32, %v1786_v33  ;;  %v361_v58 = vrot.slane %v4505_v34, 1  ;;  %v357_v41 = vor.u32 %v4471_v39, %v353_v9 }
  0x35   : > { %5420 = vst [vmem:[#allocation6_spill] sm:$0xff] %v4515_v44  ;;  %5422 = vst [vmem:[#allocation8_spill] sm:$0xff] %v4520_v47  ;;  %v5385_v53 = vrot.slane %v4512_v43, 1  ;;  %v407_v61 = vshll.u32 %v4520_v47, 16  ;;  %v1790_v9 = vrot.slane %v4320_v31, 2 }
  0x36   : > { %3573 = vmatmul.mubr.msk.bf16.gmra.mrb[12].mxu1 %vm411_vm2, %v330_v42  ;;  %v228_v42 = vld [vmem:[%s4282_s28 + $0xe8] sm:$0xff]  ;;  %v365_v32 = vor.u32 %v4515_v44, %v361_v58 }
  0x37   : > { %3576 = vmatprep.mubr.msk.bf16.mxu1 %vm411_vm2, %v338_v46  ;;  %v4518_v46 = vshll.u32 %v4494_v12, 16 }
  0x38   : > { %3725 = vmatmul.mubr.msk.bf16.gmra.mrb[12].mxu0 %vm411_vm2, %v1461_v49  ;;  %v4523_v49 = vshrl.u32 %v4496_v23, 16 }
  0x39   : > { %3728 = vmatprep.mubr.msk.bf16.mxu0 %vm411_vm2, %v1465_v59  ;;  %5421 = vst [vmem:[#allocation7_spill] sm:$0xff] %v4518_v46  ;;  %v4533_v59 = vpack.c.bf16 %v228_v42, %v227_v37  ;;  %v4544_v37 = vpack.c.bf16 %v230_v52, %v229_v51  ;;  %v409_v42 = vrot.slane %v407_v61, 1  ;;  %v231_v51 = vld [vmem:[%s4282_s28 + $0x100] sm:$0xff]  ;;  %v232_v52 = vld [vmem:[%s4282_s28 + $0x108] sm:$0xff] }
  0x3a   : > { %5423 = vst [vmem:[#allocation9_spill] sm:$0xff] %v4523_v49  ;;  %v405_v5 = vor.u32 %v4523_v49, %v5385_v53  ;;  %v4557_v49 = vshrl.u32 %v4494_v12, 16 }
  0x3b   : > { %v4550_v25 = vshll.u32 %v4533_v59, 16  ;;  %v4566_v2 = vshll.u32 %v4544_v37, 16 }
  0x3c   : > { %v4553_v53 = vsel %vm262_vm1, %v405_v5, %v409_v42  ;;  %5425 = vst [vmem:[#allocation11_spill] sm:$0xff] %v4557_v49  ;;  %v236_v5 = vld [vmem:[%s4282_s28 + $0x128] sm:$0xff]  ;;  %v4579_v42 = vpack.c.bf16 %v232_v52, %v231_v51  ;;  %v238_v51 = vld [vmem:[%s4282_s28 + $0x138] sm:$0xff]  ;;  %v4599_v52 = vld [vmem:[%s4282_s28 + $0x130] sm:$0xff] }
  0x3d   : > { %5424 = vst [vmem:[#allocation10_spill] sm:$0xff] %v4550_v25  ;;  %5427 = vst [vmem:[#allocation13_spill] sm:$0xff] %v4566_v2 }
  0x3e   : > { %3577 = vmatmul.mubr.msk.bf16.gmra.mrb[16].mxu1 %vm411_vm2, %v346_v35  ;;  %v369_v35 = vrot.slane %v4518_v46, 1 }
  0x3f   : > { %3580 = vmatprep.mubr.msk.bf16.mxu1 %vm411_vm2, %v354_v36  ;;  %v1788_v36 = vrot.slane %v4302_v21, 2 }
  0x40   : > { %3729 = vmatmul.mubr.msk.bf16.gmra.mrb[16].mxu0 %vm411_vm2, %v1469_v50  ;;  %v362_v50 = vsel %vm262_vm1, %v357_v41, %v361_v58  ;;  %v370_v61 = vsel %vm262_vm1, %v365_v32, %v369_v35  ;;  %v2109_v58 = vsel %vm466_vm0, %v4368_v7, 0  ;;  %v377_v32 = vrot.slane %v4550_v25, 1 }
  0x41   : > { %3750 = vmatprep.mubr.msk.bf16.mxu0 %vm411_vm2, %v1787_v55  ;;  %v4563_v55 = vshrl.u32 %v4533_v59, 16  ;;  %v4569_v46 = vsel %vm1784_vm4, %v1786_v33, %v1788_v36  ;;  %v4576_v41 = vsel %vm1784_vm4, %v1788_v36, %v1790_v9  ;;  %v373_v34 = vor.u32 %v4557_v49, %v369_v35  ;;  %v4586_v33 = vld [vmem:[%s5380_s1 + $0xe] sm:$0x3] }
  0x42   : > { %v385_v36 = vrot.slane %v4566_v2, 1  ;;  %v1792_v35 = vrot.slane %v4359_v3, 2  ;;  %v4603_v25 = vshll.u32 %v4579_v42, 16 }
  0x43   : > { %5426 = vst [vmem:[#allocation12_spill] sm:$0xff] %v4563_v55  ;;  %v381_v7 = vor.u32 %v4563_v55, %v377_v32  ;;  %v4616_v55 = vshrl.u32 %v4579_v42, 16 }
  0x44   : > { %5429 = vst [vmem:[#allocation15_spill] sm:$0xff] %v4603_v25  ;;  %v4623_v47 = vsel %vm1784_vm4, %v1790_v9, %v1792_v35 }
  0x45   : > { %v386_v2 = vsel %vm262_vm1, %v381_v7, %v385_v36  ;;  %5432 = vst [vmem:[#allocation18_spill] sm:$0xff] %v4616_v55 }
  0x46   : > { %3581 = vmatmul.mubr.msk.bf16.gmra.mrb[20].mxu1 %vm411_vm2, %v362_v50  ;;  %v4592_v50 = vpack.c.bf16 %v236_v5, %v235_v28  ;;  %v4608_v28 = vpack.c.bf16 %v238_v51, %v4599_v52  ;;  %v378_v5 = vsel %vm262_vm1, %v373_v34, %v377_v32  ;;  %v393_v32 = vrot.slane %v4603_v25, 1 }
  0x47   : > { %3584 = vmatprep.mubr.msk.bf16.mxu1 %vm411_vm2, %v370_v61  ;;  %v1794_v61 = vrot.slane %v4361_v4, 2  ;;  %v1796_v25 = vrot.slane %v4373_v11, 2 }
  0x48   : > { %3751 = vmatmul.mubr.msk.bf16.vlgmr.msra.gmra.mrb[0].mxu0 %vm411_vm2, %v4569_v46  ;;  %5428 = vst [vmem:[#allocation14_spill] sm:$0xff] %v4592_v50  ;;  %5430 = vst [vmem:[#allocation16_spill] sm:$0xff] %v4608_v28  ;;  %v4619_v49 = vrot.slane %v4592_v50, 2  ;;  %v5406_v44 = vrot.slane %v4608_v28, 2  ;;  %v397_v9 = vor.u32 %v4616_v55, %v393_v32  ;;  %v5434_v28 = vrot.slane %v4512_v43, 1 }
  0x49   : > { %3787 = vmatpush3.bf16.msra.mxu0 %v2109_v58  ;;  %3754 = vmatprep.mubr.msk.bf16.mxu0 %vm411_vm2, %v4576_v41  ;;  %v4612_v58 = vshrl.u32 %v4544_v37, 16  ;;  %v4627_v34 = vsel %vm1784_vm4, %v1792_v35, %v1794_v61  ;;  %v2327_v35 = vrot.slane %v4312_v27, 2  ;;  %v2334_v27 = vrot.slane %v4340_v54, 2 }
  0x4a   : > { %4198 = vmatprep.subr.msk.bf16.mxu0 %vm466_vm0, %v4586_v33  ;;  %v4634_v7 = vsel %vm1784_vm4, %v4619_v49, %v5406_v44  ;;  %v2330_v44 = vrot.slane %v4318_v30, 2  ;;  %v4656_v0 = vsel %vm1784_vm4, %v1794_v61, %v1796_v25  ;;  %v1800_v54 = vrot.slane %v4431_v56, 2 }
  0x4b   : > { %5431 = vst [vmem:[#allocation17_spill] sm:$0xff] %v4612_v58  ;;  %5433 = vst [vmem:[#allocation19_spill] sm:$0xff] %v4634_v7  ;;  %v389_v51 = vor.u32 %v4612_v58, %v385_v36  ;;  %v1798_v36 = vrot.slane %v4395_v22, 2  ;;  %v402_v7 = vsel %vm262_vm1, %v397_v9, %v5434_v28  ;;  %v2342_v28 = vrot.slane %v4387_v19, 2 }
  0x4c   : > { %v2346_v19 = vrot.slane %v4393_v17, 2  ;;  %v1806_v9 = vrot.slane %v4487_v60, 2  ;;  %v4716_v17 = vld [vmem:[%s5380_s1 + $0x6] sm:$0x3] }
  0x4d   : > { %v394_v50 = vsel %vm262_vm1, %v389_v51, %v393_v32  ;;  %v4663_v32 = vsel %vm1784_vm4, %v1796_v25, %v1798_v36  ;;  %v1802_v25 = vrot.slane %v4433_v57, 2  ;;  %v2347_v51 = vrot.slane %v4390_v20, 3 }
  0x4e   : > { %3585 = vmatmul.mubr.msk.bf16.gmra.mrb[24].mxu1 %vm411_vm2, %v378_v5  ;;  %v2328_v5 = vrot.slane %v4309_v26, 3  ;;  %v2335_v26 = vrot.slane %v4332_v48, 3 }
  0x4f   : > { %3588 = vmatprep.mubr.msk.bf16.mxu1 %vm411_vm2, %v386_v2  ;;  %v2331_v2 = vrot.slane %v4315_v29, 3 }
  0x50   : > { %3755 = vmatmul.mubr.msk.bf16.gmra.mrb[4].mxu0 %vm411_vm2, %v4623_v47  ;;  %v2329_v58 = vor.u32 %v2328_v5, %v2327_v35  ;;  %v2336_v30 = vor.u32 %v2335_v26, %v2334_v27  ;;  %v2348_v35 = vor.u32 %v2347_v51, %v2346_v19  ;;  %v2350_v5 = vrot.slane %v4420_v45, 2 }
  0x51   : > { %3758 = vmatprep.mubr.msk.bf16.mxu0 %vm411_vm2, %v4627_v34  ;;  %v2332_v55 = vor.u32 %v2331_v2, %v2330_v44  ;;  %v2338_v44 = vrot.slane %v4379_v16, 2  ;;  %v4688_v16 = vsel %vm1784_vm4, %v1800_v54, %v1802_v25  ;;  %v2351_v2 = vrot.slane %v4412_v40, 3 }
  0x52   : > { %v2354_v45 = vrot.slane %v4442_v1, 2  ;;  %v1812_v19 = vrot.slane %v4544_v37, 2  ;;  %v1814_v51 = vrot.slane %v4579_v42, 2 }
  0x53   : > { %v4659_v29 = vsel %vm2326_vm5, %v2329_v58, %v2332_v55  ;;  %v4667_v48 = vsel %vm2326_vm5, %v2332_v55, %v2336_v30  ;;  %v2343_v55 = vrot.slane %v4382_v18, 3  ;;  %v4680_v58 = vsel %vm1784_vm4, %v1798_v36, %v1800_v54 }
  0x54   : > { %v977_v36 = vsel %vm466_vm0, %v4353_v62, 0  ;;  %v2352_v26 = vor.u32 %v2351_v2, %v2350_v5  ;;  %v1808_v54 = vrot.slane %v4494_v12, 2  ;;  %v4790_v2 = vpack.c.bf16 %v4599_v52, %v4599_v52 }
  0x56   : > { %3589 = vmatmul.mubr.msk.bf16.gmra.mrb[28].mxu1 %vm411_vm2, %v394_v50  ;;  %v2339_v50 = vrot.slane %v4376_v15, 3  ;;  %v2344_v15 = vor.u32 %v2343_v55, %v2342_v28  ;;  %v4726_v62 = vsel %vm2326_vm5, %v2348_v35, %v2352_v26  ;;  %v4744_v55 = vsel %vm1784_vm4, %v1806_v9, %v1808_v54 }
  0x57   : > { %3592 = vmatprep.mubr.msk.bf16.mxu1 %vm411_vm2, %v402_v7 }
  0x58   : > { %3759 = vmatmul.mubr.msk.bf16.gmra.mrb[8].mxu0 %vm411_vm2, %v4656_v0  ;;  %v2340_v61 = vor.u32 %v2339_v50, %v2338_v44  ;;  %v4708_v27 = vsel %vm2326_vm5, %v2344_v15, %v2348_v35  ;;  %v1810_v44 = vrot.slane %v4533_v59, 2 }
  0x59   : > { %3762 = vmatprep.mubr.msk.bf16.mxu0 %vm411_vm2, %v4663_v32 }
  0x5a   : > { %v4683_v7 = vsel %vm2326_vm5, %v2336_v30, %v2340_v61  ;;  %v4695_v18 = vsel %vm2326_vm5, %v2340_v61, %v2344_v15  ;;  %v2355_v30 = vrot.slane %v4439_v63, 3  ;;  %v2359_v61 = vrot.slane %v4446_v6, 3 }
  0x5b   : > { %v4749_v63 = vsel %vm1784_vm4, %v1808_v54, %v1810_v44  ;;  %v2362_v6 = vrot.slane %v4471_v39, 2  ;;  %v2363_v15 = vrot.slane %v4468_v38, 3  ;;  %v4771_v35 = vsel %vm1784_vm4, %v1810_v44, %v1812_v19 }
  0x5c   : > { %v2356_v50 = vor.u32 %v2355_v30, %v2354_v45  ;;  %v4776_v38 = vsel %vm1784_vm4, %v1812_v19, %v1814_v51  ;;  %v1816_v39 = vrot.slane %v4496_v23, 2  ;;  %v2467_v45 = vsel %vm466_vm0, %v4586_v33, 0  ;;  %v5436_v19 = vld [vmem:[#allocation19_spill] sm:$0xff] }
  0x5d   : > { %v898_v30 = vrot.slane %v4373_v11, 1 }
  0x5e   : > { %3593 = vmatmul.mubr.msk.bf16.gmra.mrb[32].mxu1 %vm411_vm2, %v4553_v53  ;;  %v1804_v53 = vrot.slane %v4454_v24, 2  ;;  %v4741_v28 = vsel %vm2326_vm5, %v2352_v26, %v2356_v50  ;;  %v4786_v5 = vsel %vm1784_vm4, %v1814_v51, %v1816_v39  ;;  %v1820_v26 = vrot.slane %v4790_v2, 2 }
  0x5f   : > { %3598 = vmatprep.mubr.msk.bf16.mxu1 %vm411_vm2, %v4288_v10 }
  0x60   : > { %3763 = vmatmul.mubr.msk.bf16.gmra.mrb[12].mxu0 %vm411_vm2, %v4680_v58  ;;  %v4711_v20 = vsel %vm1784_vm4, %v1802_v25, %v1804_v53  ;;  %v4721_v40 = vsel %vm1784_vm4, %v1804_v53, %v1806_v9  ;;  %v2358_v25 = vrot.slane %v4449_v8, 2  ;;  %v4764_v53 = vor.u32 %v2363_v15, %v2362_v6 }
  0x61   : > { %3766 = vmatprep.mubr.msk.bf16.mxu0 %vm411_vm2, %v4688_v16  ;;  %v1821_v52 = vsel %vm1784_vm4, %v4619_v49, %v1820_v26  ;;  %v904_v6 = vrot.slane %v4433_v57, 1  ;;  %v906_v15 = vrot.slane %v4454_v24, 1 }
  0x62   : > { %v2360_v1 = vor.u32 %v2359_v61, %v2358_v25  ;;  %v902_v25 = vrot.slane %v4431_v56, 1  ;;  %v239_v61 = vld [vmem:[%s4282_s28 + $0x140] sm:$0xff] }
  0x64   : > { %v4754_v8 = vsel %vm2326_vm5, %v2356_v50, %v2360_v1  ;;  %v4768_v9 = vsel %vm2326_vm5, %v2360_v1, %v4764_v53  ;;  %v900_v50 = vrot.slane %v4395_v22, 1 }
  0x66   : > { %3599 = vmatmul.mubr.msk.bf16.vlgmr.msra.gmra.mrb[0].mxu1 %vm411_vm2, %v4292_v13  ;;  %v4916_v1 = vsel %vm884_vm6, %v900_v50, %v902_v25 }
  0x67   : > { %3602 = vmatprep.mubr.msk.bf16.mxu1 %vm411_vm2, %v4294_v14  ;;  %3635 = vmatpush3.bf16.msra.mxu1 %v977_v36  ;;  %v4796_v36 = vsel %vm1784_vm4, %v1816_v39, %v4619_v49  ;;  %v4823_v49 = vld [vmem:[%s5380_s1 + $0x10] sm:$0x3] }
  0x68   : > { %3767 = vmatmul.mubr.msk.bf16.gmra.mrb[16].mxu0 %vm411_vm2, %v4711_v20  ;;  %4193 = vmatprep.subr.msk.bf16.mxu1 %vm466_vm0, %v4716_v17  ;;  %v5437_v39 = vld [vmem:[#allocation16_spill] sm:$0xff] }
  0x69   : > { %3770 = vmatprep.mubr.msk.bf16.mxu0 %vm411_vm2, %v4721_v40 }
  0x6e   : > { %3603 = vmatmul.mubr.msk.bf16.gmra.mrb[4].mxu1 %vm411_vm2, %v4302_v21 }
  0x6f   : > { %3606 = vmatprep.mubr.msk.bf16.mxu1 %vm411_vm2, %v4320_v31 }
  0x70   : > { %3771 = vmatmul.mubr.msk.bf16.gmra.mrb[20].mxu0 %vm411_vm2, %v4744_v55 }
  0x71   : > { %3774 = vmatprep.mubr.msk.bf16.mxu0 %vm411_vm2, %v4749_v63 }
  0x76   : > { %3607 = vmatmul.mubr.msk.bf16.gmra.mrb[8].mxu1 %vm411_vm2, %v4359_v3 }
  0x77   : > { %3610 = vmatprep.mubr.msk.bf16.mxu1 %vm411_vm2, %v4361_v4 }
  0x78   : > { %3775 = vmatmul.mubr.msk.bf16.gmra.mrb[24].mxu0 %vm411_vm2, %v4771_v35 }
  0x79   : > { %3778 = vmatprep.mubr.msk.bf16.mxu0 %vm411_vm2, %v4776_v38 }
  0x7e   : > { %3611 = vmatmul.mubr.msk.bf16.gmra.mrb[12].mxu1 %vm411_vm2, %v4373_v11 }
  0x7f   : > { %3614 = vmatprep.mubr.msk.bf16.mxu1 %vm411_vm2, %v4395_v22 }
  0x80   : > { %3779 = vmatmul.mubr.msk.bf16.gmra.mrb[28].mxu0 %vm411_vm2, %v4786_v5 }
  0x81   : > { %3782 = vmatprep.mubr.msk.bf16.mxu0 %vm411_vm2, %v4796_v36 }
  0x86   : > { %3615 = vmatmul.mubr.msk.bf16.gmra.mrb[16].mxu1 %vm411_vm2, %v4431_v56 }
  0x87   : > { %3618 = vmatprep.mubr.msk.bf16.mxu1 %vm411_vm2, %v4433_v57 }
  0x88   : > { %3783 = vmatmul.mubr.msk.bf16.gmra.mrb[32].mxu0 %vm411_vm2, %v1821_v52 }
  0x89   : > { %3788 = vmatprep.mubr.msk.bf16.mxu0 %vm411_vm2, %v4569_v46  ;;  %v885_v46 = vrot.slane %v4288_v10, 1  ;;  %v890_v10 = vrot.slane %v4302_v21, 1 }
  0x8e   : > { %3619 = vmatmul.mubr.msk.bf16.gmra.mrb[20].mxu1 %vm411_vm2, %v4454_v24 }
  0x8f   : > { %3622 = vmatprep.mubr.msk.bf16.mxu1 %vm411_vm2, %v4487_v60 }
  0x90   : > { %3789 = vmatmul.mubr.msk.bf16.vlgmr.msra.gmra.mrb[0].mxu0 %vm411_vm2, %v4576_v41 }
  0x91   : > { %3825 = vmatpush3.bf16.msra.mxu0 %v2467_v45  ;;  %3792 = vmatprep.mubr.msk.bf16.mxu0 %vm411_vm2, %v4623_v47  ;;  %v886_v47 = vrot.slane %v4292_v13, 1 }
  0x92   : > { %4199 = vmatprep.subr.msk.bf16.mxu0 %vm466_vm0, %v4823_v49 }
  0x93   : > { %v887_v41 = vsel %vm884_vm6, %v885_v46, %v886_v47  ;;  %v908_v46 = vrot.slane %v4487_v60, 1 }
  0x96   : > { %3623 = vmatmul.mubr.msk.bf16.gmra.mrb[24].mxu1 %vm411_vm2, %v4494_v12 }
  0x97   : > { %3626 = vmatprep.mubr.msk.bf16.mxu1 %vm411_vm2, %v4533_v59 }
  0x98   : > { %3793 = vmatmul.mubr.msk.bf16.gmra.mrb[4].mxu0 %vm411_vm2, %v4627_v34  ;;  %v1209_v34 = vsel %vm466_vm0, %v4716_v17, 0 }
  0x99   : > { %3796 = vmatprep.mubr.msk.bf16.mxu0 %vm411_vm2, %v4656_v0  ;;  %v888_v0 = vrot.slane %v4294_v14, 1 }
  0x9b   : > { %v4860_v13 = vsel %vm884_vm6, %v886_v47, %v888_v0  ;;  %v4863_v33 = vsel %vm884_vm6, %v888_v0, %v890_v10  ;;  %v910_v47 = vrot.slane %v4494_v12, 1 }
  0x9e   : > { %3627 = vmatmul.mubr.msk.bf16.gmra.mrb[28].mxu1 %vm411_vm2, %v4544_v37 }
  0x9f   : > { %3630 = vmatprep.mubr.msk.bf16.mxu1 %vm411_vm2, %v4579_v42 }
  0xa0   : > { %3797 = vmatmul.mubr.msk.bf16.gmra.mrb[8].mxu0 %vm411_vm2, %v4663_v32  ;;  %v892_v32 = vrot.slane %v4320_v31, 1 }
  0xa1   : > { %3800 = vmatprep.mubr.msk.bf16.mxu0 %vm411_vm2, %v4680_v58  ;;  %v894_v58 = vrot.slane %v4359_v3, 1 }
  0xa3   : > { %v4883_v17 = vsel %vm884_vm6, %v892_v32, %v894_v58 }
  0xa6   : > { %3631 = vmatmul.mubr.msk.bf16.gmra.mrb[32].mxu1 %vm411_vm2, %v4496_v23 }
  0xa7   : > { %3636 = vmatprep.mubr.msk.bf16.mxu1 %vm411_vm2, %v887_v41 }
  0xa8   : > { %3801 = vmatmul.mubr.msk.bf16.gmra.mrb[12].mxu0 %vm411_vm2, %v4688_v16  ;;  %v5435_v16 = vld [vmem:[#allocation2_spill] sm:$0xff] }
  0xa9   : > { %3804 = vmatprep.mubr.msk.bf16.mxu0 %vm411_vm2, %v4711_v20  ;;  %v4880_v20 = vsel %vm884_vm6, %v890_v10, %v892_v32  ;;  %v4961_v32 = vsel %vm884_vm6, %v908_v46, %v910_v47 }
  0xae   : > { %3637 = vmatmul.mubr.msk.bf16.vlgmr.msra.gmra.mrb[0].mxu1 %vm411_vm2, %v4860_v13 }
  0xaf   : > { %3640 = vmatprep.mubr.msk.bf16.mxu1 %vm411_vm2, %v4863_v33  ;;  %3673 = vmatpush3.bf16.msra.mxu1 %v1209_v34  ;;  %v4958_v34 = vsel %vm884_vm6, %v906_v15, %v908_v46 }
  0xb0   : > { %3805 = vmatmul.mubr.msk.bf16.gmra.mrb[16].mxu0 %vm411_vm2, %v4721_v40  ;;  %4195 = vmatprep.subr.msk.bf16.mxu1 %vm466_vm0, %v5435_v16  ;;  %v896_v40 = vrot.slane %v4361_v4, 1  ;;  %v912_v16 = vrot.slane %v4533_v59, 1 }
  0xb1   : > { %3808 = vmatprep.mubr.msk.bf16.mxu0 %vm411_vm2, %v4744_v55  ;;  %v4913_v55 = vsel %vm884_vm6, %v898_v30, %v900_v50 }
  0xb2   : > { %v4896_v54 = vsel %vm884_vm6, %v894_v58, %v896_v40  ;;  %v4899_v44 = vsel %vm884_vm6, %v896_v40, %v898_v30  ;;  %v2777_v58 = vsel %vm466_vm0, %v4823_v49, 0  ;;  %v4976_v40 = vsel %vm884_vm6, %v910_v47, %v912_v16 }
  0xb3   : > { %v4989_v49 = vrot.slane %v4496_v23, 1 }
  0xb6   : > { %3641 = vmatmul.mubr.msk.bf16.gmra.mrb[4].mxu1 %vm411_vm2, %v4880_v20 }
  0xb7   : > { %3644 = vmatprep.mubr.msk.bf16.mxu1 %vm411_vm2, %v4883_v17 }
  0xb8   : > { %3809 = vmatmul.mubr.msk.bf16.gmra.mrb[20].mxu0 %vm411_vm2, %v4749_v63  ;;  %v4918_v63 = vpack.c.bf16 %v239_v61, %v239_v61  ;;  %v5441_v61 = vld [vmem:[#allocation6_spill] sm:$0xff] }
  0xb9   : > { %3812 = vmatprep.mubr.msk.bf16.mxu0 %vm411_vm2, %v4771_v35  ;;  %v4932_v35 = vsel %vm884_vm6, %v902_v25, %v904_v6 }
  0xba   : > { %v2100_v51 = vrot.slane %v4918_v63, 2 }
  0xbe   : > { %3645 = vmatmul.mubr.msk.bf16.gmra.mrb[8].mxu1 %vm411_vm2, %v4896_v54 }
  0xbf   : > { %3648 = vmatprep.mubr.msk.bf16.mxu1 %vm411_vm2, %v4899_v44 }
  0xc0   : > { %3813 = vmatmul.mubr.msk.bf16.gmra.mrb[24].mxu0 %vm411_vm2, %v4776_v38  ;;  %v4935_v38 = vsel %vm884_vm6, %v904_v6, %v906_v15  ;;  %v2366_v6 = vrot.slane %v5441_v61, 2  ;;  %v5442_v15 = vld [vmem:[#allocation5_spill] sm:$0xff] }
  0xc1   : > { %3816 = vmatprep.mubr.msk.bf16.mxu0 %vm411_vm2, %v4786_v5  ;;  %v5438_v5 = vrot.slane %v5437_v39, 2 }
  0xc3   : > { %v2101_v26 = vsel %vm1784_vm4, %v5438_v5, %v2100_v51  ;;  %v5443_v51 = vld [vmem:[#allocation11_spill] sm:$0xff] }
  0xc4   : > { %v2370_v5 = vrot.slane %v5443_v51, 2 }
  0xc6   : > { %3649 = vmatmul.mubr.msk.bf16.gmra.mrb[12].mxu1 %vm411_vm2, %v4913_v55 }
  0xc7   : > { %3652 = vmatprep.mubr.msk.bf16.mxu1 %vm411_vm2, %v4916_v1 }
  0xc8   : > { %3817 = vmatmul.mubr.msk.bf16.gmra.mrb[28].mxu0 %vm411_vm2, %v4796_v36  ;;  %v5439_v36 = vld [vmem:[#allocation14_spill] sm:$0xff] }
  0xc9   : > { %3820 = vmatprep.mubr.msk.bf16.mxu0 %vm411_vm2, %v5436_v19  ;;  %v1495_v52 = vshrl.u32 %v5439_v36, 16  ;;  %v1498_v45 = vshll.u32 %v5439_v36, 16  ;;  %v2367_v19 = vrot.slane %v5442_v15, 3 }
  0xcb   : > { %v1497_v41 = vrot.slane %v1495_v52, 1  ;;  %v1500_v0 = vrot.slane %v1498_v45, 2 }
  0xcd   : > { %v4955_v10 = vor.u32 %v1500_v0, %v1497_v41  ;;  %v5445_v41 = vld [vmem:[#allocation12_spill] sm:$0xff] }
  0xce   : > { %3653 = vmatmul.mubr.msk.bf16.gmra.mrb[16].mxu1 %vm411_vm2, %v4932_v35  ;;  %v2374_v0 = vrot.slane %v5445_v41, 2 }
  0xcf   : > { %3656 = vmatprep.mubr.msk.bf16.mxu1 %vm411_vm2, %v4935_v38 }
  0xd0   : > { %3821 = vmatmul.mubr.msk.bf16.gmra.mrb[32].mxu0 %vm411_vm2, %v2101_v26  ;;  %v5444_v26 = vld [vmem:[#allocation7_spill] sm:$0xff] }
  0xd1   : > { %3826 = vmatprep.mubr.msk.bf16.mxu0 %vm411_vm2, %v4659_v29  ;;  %v914_v29 = vrot.slane %v4544_v37, 1  ;;  %v2371_v46 = vrot.slane %v5444_v26, 3 }
  0xd3   : > { %v4979_v30 = vsel %vm884_vm6, %v912_v16, %v914_v29 }
  0xd6   : > { %3657 = vmatmul.mubr.msk.bf16.gmra.mrb[20].mxu1 %vm411_vm2, %v4958_v34 }
  0xd7   : > { %3660 = vmatprep.mubr.msk.bf16.mxu1 %vm411_vm2, %v4961_v32 }
  0xd8   : > { %3827 = vmatmul.mubr.msk.bf16.vlgmr.msra.gmra.mrb[0].mxu0 %vm411_vm2, %v4667_v48  ;;  %v916_v48 = vrot.slane %v4579_v42, 1 }
  0xd9   : > { %3863 = vmatpush3.bf16.msra.mxu0 %v2777_v58  ;;  %3830 = vmatprep.mubr.msk.bf16.mxu0 %vm411_vm2, %v4683_v7  ;;  %v5446_v58 = vld [vmem:[#allocation10_spill] sm:$0xff] }
  0xda   : > { %v4994_v7 = vsel %vm884_vm6, %v914_v29, %v916_v48  ;;  %v4998_v50 = vsel %vm884_vm6, %v916_v48, %v4989_v49  ;;  %v2375_v16 = vrot.slane %v5446_v58, 3  ;;  %v5447_v29 = vld [vmem:[#allocation17_spill] sm:$0xff] }
  0xdb   : > { %v2378_v48 = vrot.slane %v5447_v29, 2 }
  0xde   : > { %3661 = vmatmul.mubr.msk.bf16.gmra.mrb[24].mxu1 %vm411_vm2, %v4976_v40 }
  0xdf   : > { %3664 = vmatprep.mubr.msk.bf16.mxu1 %vm411_vm2, %v4979_v30 }
  0xe0   : > { %3831 = vmatmul.mubr.msk.bf16.gmra.mrb[4].mxu0 %vm411_vm2, %v4695_v18  ;;  %v5440_v18 = vld [vmem:[#allocation8_spill] sm:$0xff] }
  0xe1   : > { %3834 = vmatprep.mubr.msk.bf16.mxu0 %vm411_vm2, %v4708_v27  ;;  %v920_v25 = vrot.slane %v5440_v18, 1 }
  0xe3   : > { %v921_v27 = vsel %vm884_vm6, %v4989_v49, %v920_v25 }
  0xe6   : > { %3665 = vmatmul.mubr.msk.bf16.gmra.mrb[28].mxu1 %vm411_vm2, %v4994_v7 }
  0xe7   : > { %3668 = vmatprep.mubr.msk.bf16.mxu1 %vm411_vm2, %v4998_v50 }
  0xe8   : > { %3835 = vmatmul.mubr.msk.bf16.gmra.mrb[8].mxu0 %vm411_vm2, %v4726_v62  ;;  %v2368_v62 = vor.u32 %v2367_v19, %v2366_v6  ;;  %v5451_v19 = vld [vmem:[#allocation15_spill] sm:$0xff] }
  0xe9   : > { %3838 = vmatprep.mubr.msk.bf16.mxu0 %vm411_vm2, %v4741_v28  ;;  %v2372_v28 = vor.u32 %v2371_v46, %v2370_v5  ;;  %v2383_v5 = vrot.slane %v5451_v19, 3 }
  0xea   : > { %v2369_v47 = vsel %vm2326_vm5, %v4764_v53, %v2368_v62  ;;  %v2376_v53 = vor.u32 %v2375_v16, %v2374_v0  ;;  %v2395_v0 = vshrl.u32 %v5437_v39, 16  ;;  %v2398_v16 = vshll.u32 %v5437_v39, 16 }
  0xee   : > { %3669 = vmatmul.mubr.msk.bf16.gmra.mrb[32].mxu1 %vm411_vm2, %v921_v27  ;;  %v2377_v27 = vsel %vm2326_vm5, %v2372_v28, %v2376_v53 }
  0xef   : > { %3674 = vmatprep.mubr.msk.bf16.mxu1 %vm411_vm2, %v4860_v13  ;;  %v2373_v13 = vsel %vm2326_vm5, %v2368_v62, %v2372_v28 }
  0xf0   : > { %3839 = vmatmul.mubr.msk.bf16.gmra.mrb[12].mxu0 %vm411_vm2, %v4754_v8  ;;  %v5448_v8 = vld [vmem:[#allocation13_spill] sm:$0xff] }
  0xf1   : > { %3842 = vmatprep.mubr.msk.bf16.mxu0 %vm411_vm2, %v4768_v9  ;;  %v2379_v18 = vrot.slane %v5448_v8, 3  ;;  %v5449_v9 = vld [vmem:[#allocation3_spill] sm:$0xff] }
  0xf3   : > { %v2380_v25 = vor.u32 %v2379_v18, %v2378_v48  ;;  %v2391_v48 = vrot.slane %v1498_v45, 3  ;;  %v2397_v18 = vrot.slane %v2395_v0, 2  ;;  %v1471_v0 = vrot.slane %v5442_v15, 2 }
  0xf5   : > { %v2381_v46 = vsel %vm2326_vm5, %v2376_v53, %v2380_v25  ;;  %v2400_v53 = vrot.slane %v2398_v16, 3 }
  0xf6   : > { %3675 = vmatmul.mubr.msk.bf16.vlgmr.msra.gmra.mrb[0].mxu1 %vm411_vm2, %v4863_v33  ;;  %v5450_v33 = vld [vmem:[#allocation18_spill] sm:$0xff] }
  0xf7   : > { %3678 = vmatprep.mubr.msk.bf16.mxu1 %vm411_vm2, %v4880_v20  ;;  %3901 = vmatpush3.bf16.msra.mxu1 %v5449_v9  ;;  %v2382_v6 = vrot.slane %v5450_v33, 2  ;;  %v5452_v20 = vld [vmem:[#allocation9_spill] sm:$0xff]  ;;  %v2387_v9 = vrot.slane %v4512_v43, 3  ;;  %v2401_v45 = vor.u32 %v2400_v53, %v2397_v18  ;;  %v1479_v18 = vrot.slane %v5446_v58, 2 }
  0xf8   : > { %3843 = vmatmul.mubr.msk.bf16.gmra.mrb[16].mxu0 %vm411_vm2, %v2369_v47  ;;  %v2386_v62 = vrot.slane %v5452_v20, 2 }
  0xf9   : > { %3846 = vmatprep.mubr.msk.bf16.mxu0 %vm411_vm2, %v2373_v13  ;;  %v2384_v28 = vor.u32 %v2383_v5, %v2382_v6  ;;  %v2390_v13 = vrot.slane %v1495_v52, 2  ;;  %v2404_v52 = vshrl.u32 %v4918_v63, 16 }
  0xfa   : > { %v2388_v47 = vor.u32 %v2387_v9, %v2386_v62  ;;  %v2685_v62 = vrot.slane %v4294_v14, 3  ;;  %v2686_v9 = vrot.slane %v4302_v21, 3  ;;  %v2690_v14 = vrot.slane %v4359_v3, 3 }
  0xfe   : > { %3679 = vmatmul.mubr.msk.bf16.gmra.mrb[4].mxu1 %vm411_vm2, %v4883_v17  ;;  %v2385_v17 = vsel %vm2326_vm5, %v2380_v25, %v2384_v28  ;;  %v2392_v25 = vor.u32 %v2391_v48, %v2390_v13  ;;  %v5453_v13 = vld [vmem:[#allocation4_spill] sm:$0xff] }
  0xff   : > { %3682 = vmatprep.mubr.msk.bf16.mxu1 %vm411_vm2, %v4896_v54  ;;  %v2389_v54 = vsel %vm2326_vm5, %v2384_v28, %v2388_v47 }
 0x100   : > { %3847 = vmatmul.mubr.msk.bf16.gmra.mrb[20].mxu0 %vm411_vm2, %v2377_v27  ;;  %v2407_v27 = vshll.u32 %v4918_v63, 16  ;;  %v2393_v6 = vsel %vm2326_vm5, %v2388_v47, %v2392_v25 }
 0x101   : > { %3850 = vmatprep.mubr.msk.bf16.mxu0 %vm411_vm2, %v2381_v46  ;;  %v2402_v46 = vsel %vm2326_vm5, %v2392_v25, %v2401_v45  ;;  %v1482_v25 = vrot.slane %v5447_v29, 1 }
 0x102   : > { %v2409_v5 = vrot.slane %v2407_v27, 3 }
 0x106   : > { %3683 = vmatmul.mubr.msk.bf16.gmra.mrb[8].mxu1 %vm411_vm2, %v4899_v44  ;;  %v2406_v44 = vrot.slane %v2404_v52, 2  ;;  %v1483_v52 = vrot.slane %v5448_v8, 2  ;;  %v2708_v8 = vrot.slane %v4533_v59, 3  ;;  %v1504_v59 = vshrl.u32 %v4790_v2, 16 }
 0x107   : > { %3686 = vmatprep.mubr.msk.bf16.mxu1 %vm411_vm2, %v4913_v55 }
 0x108   : > { %3851 = vmatmul.mubr.msk.bf16.gmra.mrb[24].mxu0 %vm411_vm2, %v2385_v17  ;;  %v2410_v55 = vor.u32 %v2409_v5, %v2406_v44  ;;  %v1474_v17 = vrot.slane %v5443_v51, 1  ;;  %v1490_v5 = vrot.slane %v5452_v20, 1  ;;  %v2714_v20 = vrot.slane %v4496_v23, 3 }
 0x109   : > { %3854 = vmatprep.mubr.msk.bf16.mxu0 %vm411_vm2, %v2389_v54  ;;  %v1478_v54 = vrot.slane %v5445_v41, 1  ;;  %v2706_v41 = vrot.slane %v4494_v12, 3  ;;  %v1484_v12 = vor.u32 %v1483_v52, %v1482_v25  ;;  %v2716_v23 = vrot.slane %v5439_v36, 3 }
 0x10a   : > { %v2411_v28 = vsel %vm2326_vm5, %v2401_v45, %v2410_v55  ;;  %v1486_v45 = vrot.slane %v5450_v33, 1  ;;  %v2710_v33 = vrot.slane %v4544_v37, 3  ;;  %v1507_v37 = vshll.u32 %v4790_v2, 16 }
 0x10b   : > { %v1480_v51 = vor.u32 %v1479_v18, %v1478_v54 }
 0x10e   : > { %3687 = vmatmul.mubr.msk.bf16.gmra.mrb[12].mxu1 %vm411_vm2, %v4916_v1  ;;  %v2687_v1 = vsel %vm2684_vm7, %v2685_v62, %v2686_v9  ;;  %v2709_v62 = vsel %vm2684_vm7, %v2706_v41, %v2708_v8 }
 0x10f   : > { %3690 = vmatprep.mubr.msk.bf16.mxu1 %vm411_vm2, %v4932_v35  ;;  %v2688_v35 = vrot.slane %v4320_v31, 3  ;;  %v2694_v31 = vrot.slane %v4373_v11, 3  ;;  %v2698_v11 = vrot.slane %v4431_v56, 3 }
 0x110   : > { %3855 = vmatmul.mubr.msk.bf16.gmra.mrb[28].mxu0 %vm411_vm2, %v2393_v6  ;;  %v1487_v6 = vrot.slane %v5451_v19, 2  ;;  %v1485_v19 = vsel %vm1426_vm3, %v1480_v51, %v1484_v12 }
 0x111   : > { %3858 = vmatprep.mubr.msk.bf16.mxu0 %vm411_vm2, %v2402_v46  ;;  %v2689_v21 = vsel %vm2684_vm7, %v2686_v9, %v2688_v35  ;;  %v1491_v46 = vrot.slane %v4512_v43, 2  ;;  %v2711_v9 = vsel %vm2684_vm7, %v2708_v8, %v2710_v33  ;;  %v2712_v43 = vrot.slane %v4579_v42, 3 }
 0x112   : > { %v1488_v29 = vor.u32 %v1487_v6, %v1486_v45  ;;  %v2718_v42 = vrot.slane %v5437_v39, 3 }
 0x114   : > { %v1489_v55 = vsel %vm1426_vm3, %v1484_v12, %v1488_v29 }
 0x116   : > { %3691 = vmatmul.mubr.msk.bf16.gmra.mrb[16].mxu1 %vm411_vm2, %v4935_v38  ;;  %v2691_v38 = vsel %vm2684_vm7, %v2688_v35, %v2690_v14  ;;  %v1506_v35 = vrot.slane %v1504_v59, 1 }
 0x117   : > { %3694 = vmatprep.mubr.msk.bf16.mxu1 %vm411_vm2, %v4958_v34  ;;  %v2692_v34 = vrot.slane %v4361_v4, 3  ;;  %v2696_v4 = vrot.slane %v4395_v22, 3  ;;  %v1200_v22 = vrot.slane %v4790_v2, 1  ;;  %v2715_v2 = vsel %vm2684_vm7, %v2712_v43, %v2714_v20 }
 0x118   : > { %3859 = vmatmul.mubr.msk.bf16.gmra.mrb[32].mxu0 %vm411_vm2, %v2411_v28  ;;  %v1492_v28 = vor.u32 %v1491_v46, %v1490_v5 }
 0x119   : > { %3864 = vmatprep.mubr.msk.bf16.mxu0 %vm411_vm2, %v2687_v1  ;;  %v2693_v3 = vsel %vm2684_vm7, %v2690_v14, %v2692_v34  ;;  %v2697_v16 = vsel %vm2684_vm7, %v2694_v31, %v2696_v4  ;;  %v1509_v14 = vrot.slane %v1507_v37, 2 }
 0x11a   : > { %v1493_v1 = vsel %vm1426_vm3, %v1488_v29, %v1492_v28 }
 0x11e   : > { %3695 = vmatmul.mubr.msk.bf16.gmra.mrb[20].mxu1 %vm411_vm2, %v4961_v32  ;;  %v2695_v32 = vsel %vm2684_vm7, %v2692_v34, %v2694_v31  ;;  %v1510_v34 = vor.u32 %v1509_v14, %v1506_v35 }
 0x11f   : > { %3698 = vmatprep.mubr.msk.bf16.mxu1 %vm411_vm2, %v4976_v40  ;;  %v1198_v40 = vrot.slane %v5439_v36, 1 }
 0x120   : > { %3865 = vmatmul.mubr.msk.bf16.vlgmr.msra.gmra.mrb[0].mxu0 %vm411_vm2, %v2689_v21  ;;  %v1502_v21 = vsel %vm1426_vm3, %v1492_v28, %v4955_v10  ;;  %v1511_v31 = vsel %vm1426_vm3, %v4955_v10, %v1510_v34 }
 0x121   : > { %3868 = vmatprep.mubr.msk.bf16.mxu0 %vm411_vm2, %v2691_v38  ;;  %v1199_v47 = vsel %vm884_vm6, %v4989_v49, %v1198_v40  ;;  %v2700_v49 = vrot.slane %v4433_v57, 3  ;;  %v1201_v15 = vsel %vm884_vm6, %v1198_v40, %v1200_v22  ;;  %v2713_v38 = vsel %vm2684_vm7, %v2710_v33, %v2712_v43 }
 0x122   : > { %v2720_v40 = vrot.slane %v4918_v63, 3 }
 0x123   : > { %v2701_v53 = vsel %vm2684_vm7, %v2698_v11, %v2700_v49 }
 0x126   : > { %3699 = vmatmul.mubr.msk.bf16.gmra.mrb[24].mxu1 %vm411_vm2, %v4979_v30  ;;  %v1470_v30 = vrot.slane %v5441_v61, 1  ;;  %v2702_v61 = vrot.slane %v4454_v24, 3 }
 0x127   : > { %3702 = vmatprep.mubr.msk.bf16.mxu1 %vm411_vm2, %v4994_v7  ;;  %v2699_v7 = vsel %vm2684_vm7, %v2696_v4, %v2698_v11  ;;  %v2721_v4 = vsel %vm2684_vm7, %v2718_v42, %v2720_v40 }
 0x128   : > { %3869 = vmatmul.mubr.msk.bf16.gmra.mrb[4].mxu0 %vm411_vm2, %v2693_v3  ;;  %v1472_v56 = vor.u32 %v1471_v0, %v1470_v30  ;;  %v2703_v57 = vsel %vm2684_vm7, %v2700_v49, %v2702_v61  ;;  %v2717_v3 = vsel %vm2684_vm7, %v2714_v20, %v2716_v23 }
 0x129   : > { %3872 = vmatprep.mubr.msk.bf16.mxu0 %vm411_vm2, %v2695_v32  ;;  %v2719_v32 = vsel %vm2684_vm7, %v2716_v23, %v2718_v42 }
 0x12a   : > { %v1473_v48 = vsel %vm1426_vm3, %v5453_v13, %v1472_v56 }
 0x12e   : > { %3703 = vmatmul.mubr.msk.bf16.gmra.mrb[28].mxu1 %vm411_vm2, %v4998_v50  ;;  %v1475_v50 = vrot.slane %v5444_v26, 2  ;;  %v2704_v26 = vrot.slane %v4487_v60, 3 }
 0x12f   : > { %3706 = vmatprep.mubr.msk.bf16.mxu1 %vm411_vm2, %v1199_v47 }
 0x130   : > { %3873 = vmatmul.mubr.msk.bf16.gmra.mrb[8].mxu0 %vm411_vm2, %v2697_v16  ;;  %v1476_v24 = vor.u32 %v1475_v50, %v1474_v17  ;;  %v2705_v44 = vsel %vm2684_vm7, %v2702_v61, %v2704_v26  ;;  %v2707_v60 = vsel %vm2684_vm7, %v2704_v26, %v2706_v41 }
 0x131   : > { %3876 = vmatprep.mubr.msk.bf16.mxu0 %vm411_vm2, %v2699_v7 }
 0x132   : > { %v1477_v58 = vsel %vm1426_vm3, %v1472_v56, %v1476_v24  ;;  %v1481_v27 = vsel %vm1426_vm3, %v1476_v24, %v1480_v51  ;;  %v5214_v51 = vld [vmem:[%s5382_s3] ss:$0 sm:$0xff] }
 0x136   : > { %3707 = vmatmul.mubr.msk.bf16.gmra.mrb[32].mxu1 %vm411_vm2, %v1201_v15 }
 0x137   : > { %3732 = vmatprep.mubr.msk.bf16.mxu1 %vm411_vm2, %v1473_v48 }
 0x138   : > { %3877 = vmatmul.mubr.msk.bf16.gmra.mrb[12].mxu0 %vm411_vm2, %v2701_v53  ;;  %v5208_v53 = vld [vmem:[%s5381_s2] ss:$0 sm:$0xff] }
 0x139   : > { %3880 = vmatprep.mubr.msk.bf16.mxu0 %vm411_vm2, %v2703_v57 }
 0x13e   : > { %3733 = vmatmul.mubr.msk.bf16.vlgmr.msra.gmra.mrb[20].mxu1 %vm411_vm2, %v1477_v58 }
 0x13f   : > { %3736 = vmatprep.mubr.msk.bf16.mxu1 %vm411_vm2, %v1481_v27 }
 0x140   : > { %3881 = vmatmul.mubr.msk.bf16.gmra.mrb[16].mxu0 %vm411_vm2, %v2705_v44 }
 0x141   : > { %3884 = vmatprep.mubr.msk.bf16.mxu0 %vm411_vm2, %v2707_v60 }
 0x146   : > { %3737 = vmatmul.mubr.msk.bf16.gmra.mrb[24].mxu1 %vm411_vm2, %v1485_v19 }
 0x147   : > { %3740 = vmatprep.mubr.msk.bf16.mxu1 %vm411_vm2, %v1489_v55 }
 0x148   : > { %3885 = vmatmul.mubr.msk.bf16.gmra.mrb[20].mxu0 %vm411_vm2, %v2709_v62 }
 0x149   : > { %3888 = vmatprep.mubr.msk.bf16.mxu0 %vm411_vm2, %v2711_v9 }
 0x14e   : > { %3741 = vmatmul.mubr.msk.bf16.gmra.mrb[28].mxu1 %vm411_vm2, %v1493_v1 }
 0x14f   : > { %3744 = vmatprep.mubr.msk.bf16.mxu1 %vm411_vm2, %v1502_v21 }
 0x150   : > { %3889 = vmatmul.mubr.msk.bf16.gmra.mrb[24].mxu0 %vm411_vm2, %v2713_v38 }
 0x151   : > { %3892 = vmatprep.mubr.msk.bf16.mxu0 %vm411_vm2, %v2715_v2 }
 0x156   : > { %3745 = vmatmul.mubr.msk.bf16.gmra.mrb[32].mxu1 %vm411_vm2, %v1511_v31 }
 0x158   : > { %3893 = vmatmul.mubr.msk.bf16.gmra.mrb[28].mxu0 %vm411_vm2, %v2717_v3 }
 0x159   : > { %3896 = vmatprep.mubr.msk.bf16.mxu0 %vm411_vm2, %v2719_v32 }
 0x160   : > { %3897 = vmatmul.mubr.msk.bf16.gmra.mrb[32].mxu0 %vm411_vm2, %v2721_v4 }
 0x1c9   : > { %v3676_v39 = vpop.f32.mrb[0].mxu1 }
 0x1ca   : > { %v1245_v36 = vpop.f32.mrb[1].mxu1 }
 0x1cb   : > { %v3677_v11 = vpop.f32.mrb[2].mxu1 }
 0x1cc   : > { %v1248_v10 = vpop.f32.mrb[3].mxu1 }
 0x1d1   : > { %v3680_v47 = vpop.f32.mrb[4].mxu1 }
 0x1d2   : > { %v1261_v30 = vpop.f32.mrb[5].mxu1 }
 0x1d3   : > { %v3681_v0 = vpop.f32.mrb[6].mxu1 }
 0x1d4   : > { %v1264_v16 = vpop.f32.mrb[7].mxu1 }
 0x1d9   : > { %v3684_v7 = vpop.f32.mrb[8].mxu1 }
 0x1da   : > { %v5183_v22 = vpop.f32.mrb[9].mxu1 }
 0x1db   : > { %v5185_v56 = vpop.f32.mrb[10].mxu1 }
 0x1dc   : > { %v5187_v49 = vpop.f32.mrb[11].mxu1 }
 0x1e1   : > { %v5189_v63 = vpop.f32.mrb[12].mxu1 }
 0x1e2   : > { %v5191_v61 = vpop.f32.mrb[13].mxu1 }
 0x1e3   : > { %v5193_v15 = vpop.f32.mrb[14].mxu1 }
 0x1e4   : > { %v5195_v17 = vpop.f32.mrb[15].mxu1 }
 0x1e9   : > { %v5197_v50 = vpop.f32.mrb[16].mxu1 }
 0x1ea   : > { %v5199_v13 = vpop.f32.mrb[17].mxu1 }
 0x1eb   : > { %v5201_v48 = vpop.f32.mrb[18].mxu1 }
 0x1ec   : > { %v5203_v54 = vpop.f32.mrb[19].mxu1 }
 0x1f3   : > { %v3866_v18 = vpop.f32.mrb[0].mxu0 }
 0x1f4   : > { %v3902_v57 = vadd.f32 %v3866_v18, %v3676_v39  ;;  %v2813_v24 = vpop.f32.mrb[1].mxu0 }
 0x1f5   : > { %v3903_v26 = vadd.f32 %v2813_v24, %v1245_v36  ;;  %v3867_v41 = vpop.f32.mrb[2].mxu0 }
 0x1f6   : > { %v3001_v58 = vmul.f32 %v3902_v57, %v5208_v53  ;;  %v3904_v25 = vadd.f32 %v3867_v41, %v3677_v11  ;;  %v2816_v52 = vpop.f32.mrb[3].mxu0 }
 0x1f7   : > { %v2999_v27 = vmul.f32 %v3903_v26, %v5208_v53  ;;  %v3905_v45 = vadd.f32 %v2816_v52, %v1248_v10 }
 0x1f8   : > { %v3044_v6 = vadd.f32 %v5214_v51, %v3001_v58  ;;  %v3002_v44 = vmul.f32 %v3904_v25, %v5208_v53 }
 0x1f9   : > { %v3042_v60 = vadd.f32 %v5214_v51, %v2999_v27  ;;  %v3000_v12 = vmul.f32 %v3905_v45, %v5208_v53 }
 0x1fa   : > { %v3080_v29 = vmax.f32 %v3044_v6, 0.0  ;;  %v3045_v8 = vadd.f32 %v5214_v51, %v3002_v44 }
 0x1fb   : > { %v3078_v33 = vmax.f32 %v3042_v60, 0.0  ;;  %v3043_v19 = vadd.f32 %v5214_v51, %v3000_v12  ;;  %v3870_v5 = vpop.f32.mrb[4].mxu0 }
 0x1fc   : > { %3117 = vst.msk [vmem:[%s5223_s21 + $0x10] sm:$0xff] %vm3114_vm8, %v3080_v29  ;;  %v3081_v46 = vmax.f32 %v3045_v8, 0.0  ;;  %v3906_v55 = vadd.f32 %v3870_v5, %v3680_v47  ;;  %v2829_v62 = vpop.f32.mrb[5].mxu0 }
 0x1fd   : > { %3115 = vst.msk [vmem:[%s5223_s21] sm:$0xff] %vm3114_vm8, %v3078_v33  ;;  %v3079_v9 = vmax.f32 %v3043_v19, 0.0  ;;  %v3907_v28 = vadd.f32 %v2829_v62, %v1261_v30  ;;  %v3871_v59 = vpop.f32.mrb[6].mxu0 }
 0x1fe   : > { %3118 = vst.msk [vmem:[%s5223_s21 + $0x18] sm:$0xff] %vm3114_vm8, %v3081_v46  ;;  %v3005_v37 = vmul.f32 %v3906_v55, %v5208_v53  ;;  %v3908_v43 = vadd.f32 %v3871_v59, %v3681_v0  ;;  %v2832_v20 = vpop.f32.mrb[7].mxu0 }
 0x1ff   : > { %3116 = vst.msk [vmem:[%s5223_s21 + $0x8] sm:$0xff] %vm3114_vm8, %v3079_v9  ;;  %v3003_v1 = vmul.f32 %v3907_v28, %v5208_v53  ;;  %v3909_v35 = vadd.f32 %v2832_v20, %v1264_v16 }
 0x200   : > { %v3048_v14 = vadd.f32 %v5214_v51, %v3005_v37  ;;  %v3006_v21 = vmul.f32 %v3908_v43, %v5208_v53 }
 0x201   : > { %v3046_v38 = vadd.f32 %v5214_v51, %v3003_v1  ;;  %v3004_v2 = vmul.f32 %v3909_v35, %v5208_v53 }
 0x202   : > { %v3084_v34 = vmax.f32 %v3048_v14, 0.0  ;;  %v3049_v23 = vadd.f32 %v5214_v51, %v3006_v21 }
 0x203   : > { %v3082_v42 = vmax.f32 %v3046_v38, 0.0  ;;  %v3047_v31 = vadd.f32 %v5214_v51, %v3004_v2  ;;  %v3874_v3 = vpop.f32.mrb[8].mxu0 }
 0x204   : > { %3121 = vst.msk [vmem:[%s5223_s21 + $0x30] sm:$0xff] %vm3114_vm8, %v3084_v34  ;;  %v3085_v32 = vmax.f32 %v3049_v23, 0.0  ;;  %v3910_v40 = vadd.f32 %v3874_v3, %v3684_v7  ;;  %v2845_v4 = vpop.f32.mrb[9].mxu0 }
 0x205   : > { %3119 = vst.msk [vmem:[%s5223_s21 + $0x20] sm:$0xff] %vm3114_vm8, %v3082_v42  ;;  %v3083_v39 = vmax.f32 %v3047_v31, 0.0  ;;  %v3911_v36 = vadd.f32 %v2845_v4, %v5183_v22  ;;  %v3875_v11 = vpop.f32.mrb[10].mxu0 }
 0x206   : > { %3122 = vst.msk [vmem:[%s5223_s21 + $0x38] sm:$0xff] %vm3114_vm8, %v3085_v32  ;;  %v3009_v10 = vmul.f32 %v3910_v40, %v5208_v53  ;;  %v3912_v47 = vadd.f32 %v3875_v11, %v5185_v56  ;;  %v2848_v30 = vpop.f32.mrb[11].mxu0 }
 0x207   : > { %3120 = vst.msk [vmem:[%s5223_s21 + $0x28] sm:$0xff] %vm3114_vm8, %v3083_v39  ;;  %v3007_v0 = vmul.f32 %v3911_v36, %v5208_v53  ;;  %v3913_v16 = vadd.f32 %v2848_v30, %v5187_v49 }
 0x208   : > { %v3052_v7 = vadd.f32 %v5214_v51, %v3009_v10  ;;  %v3010_v22 = vmul.f32 %v3912_v47, %v5208_v53 }
 0x209   : > { %v3050_v18 = vadd.f32 %v5214_v51, %v3007_v0  ;;  %v3008_v57 = vmul.f32 %v3913_v16, %v5208_v53 }
 0x20a   : > { %v3088_v24 = vmax.f32 %v3052_v7, 0.0  ;;  %v3053_v56 = vadd.f32 %v5214_v51, %v3010_v22 }
 0x20b   : > { %v3086_v26 = vmax.f32 %v3050_v18, 0.0  ;;  %v3051_v41 = vadd.f32 %v5214_v51, %v3008_v57  ;;  %v3878_v58 = vpop.f32.mrb[12].mxu0 }
 0x20c   : > { %3125 = vst.msk [vmem:[%s5223_s21 + $0x50] sm:$0xff] %vm3114_vm8, %v3088_v24  ;;  %v3089_v49 = vmax.f32 %v3053_v56, 0.0  ;;  %v3914_v25 = vadd.f32 %v3878_v58, %v5189_v63  ;;  %v2861_v52 = vpop.f32.mrb[13].mxu0 }
 0x20d   : > { %3123 = vst.msk [vmem:[%s5223_s21 + $0x40] sm:$0xff] %vm3114_vm8, %v3086_v26  ;;  %v3087_v27 = vmax.f32 %v3051_v41, 0.0  ;;  %v3915_v45 = vadd.f32 %v2861_v52, %v5191_v61  ;;  %v3879_v6 = vpop.f32.mrb[14].mxu0 }
 0x20e   : > { %3126 = vst.msk [vmem:[%s5223_s21 + $0x58] sm:$0xff] %vm3114_vm8, %v3089_v49  ;;  %v3013_v44 = vmul.f32 %v3914_v25, %v5208_v53  ;;  %v3916_v60 = vadd.f32 %v3879_v6, %v5193_v15  ;;  %v2864_v12 = vpop.f32.mrb[15].mxu0 }
 0x20f   : > { %3124 = vst.msk [vmem:[%s5223_s21 + $0x48] sm:$0xff] %vm3114_vm8, %v3087_v27  ;;  %v3011_v29 = vmul.f32 %v3915_v45, %v5208_v53  ;;  %v3917_v63 = vadd.f32 %v2864_v12, %v5195_v17 }
 0x210   : > { %v3056_v8 = vadd.f32 %v5214_v51, %v3013_v44  ;;  %v3014_v33 = vmul.f32 %v3916_v60, %v5208_v53 }
 0x211   : > { %v3054_v61 = vadd.f32 %v5214_v51, %v3011_v29  ;;  %v3012_v19 = vmul.f32 %v3917_v63, %v5208_v53  ;;  %v3734_v5 = vpop.f32.mrb[20].mxu1 }
 0x212   : > { %v3092_v46 = vmax.f32 %v3056_v8, 0.0  ;;  %v3057_v15 = vadd.f32 %v5214_v51, %v3014_v33  ;;  %v1683_v55 = vpop.f32.mrb[21].mxu1 }
 0x213   : > { %v3090_v62 = vmax.f32 %v3054_v61, 0.0  ;;  %v3055_v9 = vadd.f32 %v5214_v51, %v3012_v19  ;;  %v3882_v17 = vpop.f32.mrb[16].mxu0  ;;  %v3735_v28 = vpop.f32.mrb[22].mxu1 }
 0x214   : > { %3129 = vst.msk [vmem:[%s5223_s21 + $0x70] sm:$0xff] %vm3114_vm8, %v3092_v46  ;;  %v3093_v59 = vmax.f32 %v3057_v15, 0.0  ;;  %v3918_v37 = vadd.f32 %v3882_v17, %v5197_v50  ;;  %v2877_v43 = vpop.f32.mrb[17].mxu0  ;;  %v1686_v20 = vpop.f32.mrb[23].mxu1 }
 0x215   : > { %3127 = vst.msk [vmem:[%s5223_s21 + $0x60] sm:$0xff] %vm3114_vm8, %v3090_v62  ;;  %v3091_v1 = vmax.f32 %v3055_v9, 0.0  ;;  %v3919_v35 = vadd.f32 %v2877_v43, %v5199_v13  ;;  %v3883_v14 = vpop.f32.mrb[18].mxu0 }
 0x216   : > { %3130 = vst.msk [vmem:[%s5223_s21 + $0x78] sm:$0xff] %vm3114_vm8, %v3093_v59  ;;  %v3017_v21 = vmul.f32 %v3918_v37, %v5208_v53  ;;  %v3920_v38 = vadd.f32 %v3883_v14, %v5201_v48  ;;  %v2880_v2 = vpop.f32.mrb[19].mxu0 }
 0x217   : > { %3128 = vst.msk [vmem:[%s5223_s21 + $0x68] sm:$0xff] %vm3114_vm8, %v3091_v1  ;;  %v3015_v50 = vmul.f32 %v3919_v35, %v5208_v53  ;;  %v3921_v34 = vadd.f32 %v2880_v2, %v5203_v54 }
 0x218   : > { %v3060_v23 = vadd.f32 %v5214_v51, %v3017_v21  ;;  %v3018_v42 = vmul.f32 %v3920_v38, %v5208_v53 }
 0x219   : > { %v3058_v13 = vadd.f32 %v5214_v51, %v3015_v50  ;;  %v3016_v31 = vmul.f32 %v3921_v34, %v5208_v53  ;;  %v3738_v3 = vpop.f32.mrb[24].mxu1 }
 0x21a   : > { %v3096_v32 = vmax.f32 %v3060_v23, 0.0  ;;  %v3061_v48 = vadd.f32 %v5214_v51, %v3018_v42  ;;  %v1699_v40 = vpop.f32.mrb[25].mxu1 }
 0x21b   : > { %v3094_v4 = vmax.f32 %v3058_v13, 0.0  ;;  %v3059_v39 = vadd.f32 %v5214_v51, %v3016_v31  ;;  %v3886_v54 = vpop.f32.mrb[20].mxu0  ;;  %v3739_v36 = vpop.f32.mrb[26].mxu1 }
 0x21c   : > { %3133 = vst.msk [vmem:[%s5223_s21 + $0x90] sm:$0xff] %vm3114_vm8, %v3096_v32  ;;  %v3097_v11 = vmax.f32 %v3061_v48, 0.0  ;;  %v3922_v10 = vadd.f32 %v3886_v54, %v3734_v5  ;;  %v2893_v47 = vpop.f32.mrb[21].mxu0  ;;  %v1702_v30 = vpop.f32.mrb[27].mxu1 }
 0x21d   : > { %3131 = vst.msk [vmem:[%s5223_s21 + $0x80] sm:$0xff] %vm3114_vm8, %v3094_v4  ;;  %v3095_v0 = vmax.f32 %v3059_v39, 0.0  ;;  %v3923_v16 = vadd.f32 %v2893_v47, %v1683_v55  ;;  %v3887_v7 = vpop.f32.mrb[22].mxu0 }
 0x21e   : > { %3134 = vst.msk [vmem:[%s5223_s21 + $0x98] sm:$0xff] %vm3114_vm8, %v3097_v11  ;;  %v3021_v22 = vmul.f32 %v3922_v10, %v5208_v53  ;;  %v3924_v18 = vadd.f32 %v3887_v7, %v3735_v28  ;;  %v2896_v57 = vpop.f32.mrb[23].mxu0 }
 0x21f   : > { %3132 = vst.msk [vmem:[%s5223_s21 + $0x88] sm:$0xff] %vm3114_vm8, %v3095_v0  ;;  %v3019_v24 = vmul.f32 %v3923_v16, %v5208_v53  ;;  %v3925_v56 = vadd.f32 %v2896_v57, %v1686_v20 }
 0x220   : > { %v3064_v26 = vadd.f32 %v5214_v51, %v3021_v22  ;;  %v3022_v41 = vmul.f32 %v3924_v18, %v5208_v53 }
 0x221   : > { %v3062_v58 = vadd.f32 %v5214_v51, %v3019_v24  ;;  %v3020_v49 = vmul.f32 %v3925_v56, %v5208_v53  ;;  %v3742_v25 = vpop.f32.mrb[28].mxu1 }
 0x222   : > { %v3100_v52 = vmax.f32 %v3064_v26, 0.0  ;;  %v3065_v27 = vadd.f32 %v5214_v51, %v3022_v41  ;;  %v1715_v45 = vpop.f32.mrb[29].mxu1 }
 0x223   : > { %v3098_v6 = vmax.f32 %v3062_v58, 0.0  ;;  %v3063_v44 = vadd.f32 %v5214_v51, %v3020_v49  ;;  %v3890_v60 = vpop.f32.mrb[24].mxu0  ;;  %v3743_v12 = vpop.f32.mrb[30].mxu1 }
 0x224   : > { %3137 = vst.msk [vmem:[%s5223_s21 + $0xb0] sm:$0xff] %vm3114_vm8, %v3100_v52  ;;  %v3101_v29 = vmax.f32 %v3065_v27, 0.0  ;;  %v3926_v63 = vadd.f32 %v3890_v60, %v3738_v3  ;;  %v2909_v8 = vpop.f32.mrb[25].mxu0  ;;  %v1718_v33 = vpop.f32.mrb[31].mxu1 }
 0x225   : > { %3135 = vst.msk [vmem:[%s5223_s21 + $0xa0] sm:$0xff] %vm3114_vm8, %v3098_v6  ;;  %v3099_v61 = vmax.f32 %v3063_v44, 0.0  ;;  %v3927_v19 = vadd.f32 %v2909_v8, %v1699_v40  ;;  %v3891_v5 = vpop.f32.mrb[26].mxu0 }
 0x226   : > { %3138 = vst.msk [vmem:[%s5223_s21 + $0xb8] sm:$0xff] %vm3114_vm8, %v3101_v29  ;;  %v3025_v46 = vmul.f32 %v3926_v63, %v5208_v53  ;;  %v3928_v15 = vadd.f32 %v3891_v5, %v3739_v36  ;;  %v2912_v55 = vpop.f32.mrb[27].mxu0 }
 0x227   : > { %3136 = vst.msk [vmem:[%s5223_s21 + $0xa8] sm:$0xff] %vm3114_vm8, %v3099_v61  ;;  %v3023_v62 = vmul.f32 %v3927_v19, %v5208_v53  ;;  %v3929_v9 = vadd.f32 %v2912_v55, %v1702_v30 }
 0x228   : > { %v3068_v17 = vadd.f32 %v5214_v51, %v3025_v46  ;;  %v3026_v28 = vmul.f32 %v3928_v15, %v5208_v53 }
 0x229   : > { %v3066_v59 = vadd.f32 %v5214_v51, %v3023_v62  ;;  %v3024_v37 = vmul.f32 %v3929_v9, %v5208_v53  ;;  %v3746_v43 = vpop.f32.mrb[32].mxu1 }
 0x22a   : > { %v3104_v20 = vmax.f32 %v3068_v17, 0.0  ;;  %v3069_v1 = vadd.f32 %v5214_v51, %v3026_v28  ;;  %v1731_v35 = vpop.f32.mrb[33].mxu1 }
 0x22b   : > { %v3102_v14 = vmax.f32 %v3066_v59, 0.0  ;;  %v3067_v21 = vadd.f32 %v5214_v51, %v3024_v37  ;;  %v3894_v38 = vpop.f32.mrb[28].mxu0  ;;  %v3747_v2 = vpop.f32.mrb[34].mxu1 }
 0x22c   : > { %3141 = vst.msk [vmem:[%s5223_s21 + $0xd0] sm:$0xff] %vm3114_vm8, %v3104_v20  ;;  %v3105_v50 = vmax.f32 %v3069_v1, 0.0  ;;  %v3930_v34 = vadd.f32 %v3894_v38, %v3742_v25  ;;  %v2925_v23 = vpop.f32.mrb[29].mxu0  ;;  %v1734_v42 = vpop.f32.mrb[35].mxu1 }
 0x22d   : > { %3139 = vst.msk [vmem:[%s5223_s21 + $0xc0] sm:$0xff] %vm3114_vm8, %v3102_v14  ;;  %v3103_v13 = vmax.f32 %v3067_v21, 0.0  ;;  %v3931_v31 = vadd.f32 %v2925_v23, %v1715_v45  ;;  %v3895_v3 = vpop.f32.mrb[30].mxu0 }
 0x22e   : > { %3142 = vst.msk [vmem:[%s5223_s21 + $0xd8] sm:$0xff] %vm3114_vm8, %v3105_v50  ;;  %v3029_v32 = vmul.f32 %v3930_v34, %v5208_v53  ;;  %v3932_v48 = vadd.f32 %v3895_v3, %v3743_v12  ;;  %v2928_v40 = vpop.f32.mrb[31].mxu0 }
 0x22f   : > { %3140 = vst.msk [vmem:[%s5223_s21 + $0xc8] sm:$0xff] %vm3114_vm8, %v3103_v13  ;;  %v3027_v4 = vmul.f32 %v3931_v31, %v5208_v53  ;;  %v3933_v39 = vadd.f32 %v2928_v40, %v1718_v33 }
 0x230   : > { %v3072_v54 = vadd.f32 %v5214_v51, %v3029_v32  ;;  %v3030_v36 = vmul.f32 %v3932_v48, %v5208_v53 }
 0x231   : > { %v3070_v11 = vadd.f32 %v5214_v51, %v3027_v4  ;;  %v3028_v10 = vmul.f32 %v3933_v39, %v5208_v53 }
 0x232   : > { %v3108_v47 = vmax.f32 %v3072_v54, 0.0  ;;  %v3073_v30 = vadd.f32 %v5214_v51, %v3030_v36 }
 0x233   : > { %v3106_v0 = vmax.f32 %v3070_v11, 0.0  ;;  %v3071_v16 = vadd.f32 %v5214_v51, %v3028_v10  ;;  %v3898_v7 = vpop.f32.mrb[32].mxu0 }
 0x234   : > { %3145 = vst.msk [vmem:[%s5223_s21 + $0xf0] sm:$0xff] %vm3114_vm8, %v3108_v47  ;;  %v3109_v22 = vmax.f32 %v3073_v30, 0.0  ;;  %v3934_v18 = vadd.f32 %v3898_v7, %v3746_v43  ;;  %v2941_v57 = vpop.f32.mrb[33].mxu0 }
 0x235   : > { %3143 = vst.msk [vmem:[%s5223_s21 + $0xe0] sm:$0xff] %vm3114_vm8, %v3106_v0  ;;  %v3107_v24 = vmax.f32 %v3071_v16, 0.0  ;;  %v3935_v56 = vadd.f32 %v2941_v57, %v1731_v35  ;;  %v3899_v26 = vpop.f32.mrb[34].mxu0 }
 0x236   : > { %3146 = vst.msk [vmem:[%s5223_s21 + $0xf8] sm:$0xff] %vm3114_vm8, %v3109_v22  ;;  %v3033_v41 = vmul.f32 %v3934_v18, %v5208_v53  ;;  %v3936_v58 = vadd.f32 %v3899_v26, %v3747_v2  ;;  %v2944_v49 = vpop.f32.mrb[35].mxu0 }
 0x237   : > { %3144 = vst.msk [vmem:[%s5223_s21 + $0xe8] sm:$0xff] %vm3114_vm8, %v3107_v24  ;;  %v3031_v25 = vmul.f32 %v3935_v56, %v5208_v53  ;;  %v3937_v52 = vadd.f32 %v2944_v49, %v1734_v42 }
 0x238   : > { %v3076_v27 = vadd.f32 %v5214_v51, %v3033_v41  ;;  %v3034_v45 = vmul.f32 %v3936_v58, %v5208_v53 }
 0x239   : > { %v3074_v6 = vadd.f32 %v5214_v51, %v3031_v25  ;;  %v3032_v44 = vmul.f32 %v3937_v52, %v5208_v53 }
 0x23a   : > { %v3112_v60 = vmax.f32 %v3076_v27, 0.0  ;;  %v3077_v12 = vadd.f32 %v5214_v51, %v3034_v45 }
 0x23b   : > { %v3110_v29 = vmax.f32 %v3074_v6, 0.0  ;;  %v3075_v63 = vadd.f32 %v5214_v51, %v3032_v44 }
 0x23c   : > { %3149 = vst.msk [vmem:[%s5223_s21 + $0x110] sm:$0xff] %vm3114_vm8, %v3112_v60  ;;  %v3113_v8 = vmax.f32 %v3077_v12, 0.0 }
 0x23d   : > { %3147 = vst.msk [vmem:[%s5223_s21 + $0x100] sm:$0xff] %vm3114_vm8, %v3110_v29  ;;  %v3111_v33 = vmax.f32 %v3075_v63, 0.0 }
 0x23e   : > { %3150 = vst.msk [vmem:[%s5223_s21 + $0x118] sm:$0xff] %vm3114_vm8, %v3113_v8 }
 0x23f   : > { %3148 = vst.msk [vmem:[%s5223_s21 + $0x108] sm:$0xff] %vm3114_vm8, %v3111_v33 }
 0x240 PF: > { %s14_s15 = sadd.s32 1, %s4216_s15  }
 0x241   : > { %p11_p4 = scmp.ge.s32.totalorder %s14_s15, 4  }
 0x243   :  { %13 = sbr.rel (!%p11_p4) target bundleno = 1 (0x1), region = 74 }

</bundles_post_ra>
